<compile_context>
chip_gen: v6e
topology: v6e:2x2x1
jax: 0.10.0
libtpu: 0.0.40
codegen_flags: <defaults>
</compile_context>

<pallas_src>
import jax
import jax.numpy as jnp
from jax.experimental import pallas as pl
from jax.experimental.pallas import tpu as pltpu


def _ffn_kernel(x_ref, w1_ref, b1_ref, w2_ref, b2_ref, o_ref, acc_ref):
    # x_ref:  (tm, d_model)            [compute dtype, e.g. bf16]
    # w1_ref: (d_model, tff)           b1_ref: (1, tff)      [f32]
    # w2_ref: (tff, d_model)           b2_ref: (1, d_model)  [f32]
    # o_ref:  (tm, d_model)            acc_ref: (tm, d_model) f32 scratch
    j = pl.program_id(1)

    @pl.when(j == 0)
    def _init():
        acc_ref[...] = jnp.zeros_like(acc_ref)

    # linear_1 slice + ReLU:  h_j = relu(x @ w1[:, j_tile] + b1[j_tile])
    h = jnp.dot(x_ref[...], w1_ref[...], preferred_element_type=jnp.float32)
    h = jnp.maximum(h + b1_ref[...], 0.0)
    # dropout: identity in eval mode

    # partial linear_2:  acc += h_j @ w2[j_tile, :]   (f32 accumulation)
    acc_ref[...] += jnp.dot(h.astype(w2_ref.dtype), w2_ref[...],
                            preferred_element_type=jnp.float32)

    @pl.when(j == pl.num_programs(1) - 1)
    def _finalize():
        # b2 added once per output tile, not per reduction step.
        o_ref[...] = (acc_ref[...] + b2_ref[...]).astype(o_ref.dtype)


def _pick_tile(dim, preferred):
    for t in preferred:
        if dim % t == 0:
            return t
    return dim


def feed_forward(x, w1, b1, w2, b2, *, tm=None, tff=None,
                 compute_dtype=jnp.bfloat16):
    """x: (batch, seq, d_model) -> (batch, seq, d_model).

    w1: (d_model, d_ff), b1: (d_ff,), w2: (d_ff, d_model), b2: (d_model,).
    For best performance pass weights already in `compute_dtype`.
    """
    batch, seq, d_model = x.shape
    d_ff = w1.shape[1]
    M = batch * seq
    out_dtype = x.dtype

    # Row tile: big enough to pipeline / fill the MXU, but never the whole slab.
    if tm is None:
        tm = _pick_tile(M, (512, 256, 128, 64, 32, 16, 8))
    # d_ff (reduction) tile: multiple of 128 (MXU-native); weights stream.
    if tff is None:
        tff = _pick_tile(d_ff, (512, 256, 128))

    assert M % tm == 0 and d_ff % tff == 0
    sublane = 16 if compute_dtype == jnp.bfloat16 else 8
    assert tm == M or tm % sublane == 0, "tm must be a multiple of the sublane tile"
    assert tff == d_ff or tff % 128 == 0, "tff must be a multiple of 128"

    xc = x.reshape(M, d_model).astype(compute_dtype)
    w1c = w1.astype(compute_dtype)
    w2c = w2.astype(compute_dtype)
    b1f = b1.reshape(1, d_ff).astype(jnp.float32)
    b2f = b2.reshape(1, d_model).astype(jnp.float32)

    # Explicit VMEM budget (double-buffered tiles + f32 accumulator) with
    # headroom, so the kernel fits the 64 MiB v7x VMEM as well as v5e/v6e.
    cb = jnp.dtype(compute_dtype).itemsize
    ob = jnp.dtype(out_dtype).itemsize
    vmem_est = (2 * tm * d_model * cb          # x tiles
                + 2 * d_model * tff * cb       # w1 tiles
                + 2 * tff * d_model * cb       # w2 tiles
                + 2 * (tff + d_model) * 4      # bias tiles
                + 2 * tm * d_model * ob        # out tiles
                + tm * d_model * 4)            # accumulator scratch
    vmem_limit = int(min(100 * 1024 * 1024, max(32 * 1024 * 1024, 4 * vmem_est)))

    # Scheduler hint for XLA around the custom call.
    flops = 4 * M * d_model * d_ff             # two matmuls, 2*M*N*K each
    bytes_accessed = (M * d_model * (cb + ob)  # x in, out
                      + 2 * d_model * d_ff * cb
                      + (d_ff + d_model) * 4)
    cost = pl.CostEstimate(flops=flops, transcendentals=0,
                           bytes_accessed=bytes_accessed)

    out2d = pl.pallas_call(
        _ffn_kernel,
        out_shape=jax.ShapeDtypeStruct((M, d_model), out_dtype),
        grid_spec=pltpu.PrefetchScalarGridSpec(
            num_scalar_prefetch=0,
            grid=(M // tm, d_ff // tff),
            in_specs=[
                pl.BlockSpec((tm, d_model), lambda i, j: (i, 0)),    # x row tile (resident over j)
                pl.BlockSpec((d_model, tff), lambda i, j: (0, j)),   # w1 column tile (streams)
                pl.BlockSpec((1, tff), lambda i, j: (0, j)),         # b1 tile
                pl.BlockSpec((tff, d_model), lambda i, j: (j, 0)),   # w2 row tile (streams)
                pl.BlockSpec((1, d_model), lambda i, j: (0, 0)),     # b2 (resident)
            ],
            out_specs=pl.BlockSpec((tm, d_model), lambda i, j: (i, 0)),
            scratch_shapes=[pltpu.VMEM((tm, d_model), jnp.float32)],
        ),
        compiler_params=pltpu.CompilerParams(
            dimension_semantics=("parallel", "arbitrary"),
            vmem_limit_bytes=vmem_limit,
        ),
        cost_estimate=cost,
    )(xc, w1c, b1f, w2c, b2f)

    return out2d.reshape(batch, seq, d_model)


def init_params(key, d_model, d_ff, dtype=jnp.float32):
    """Deterministic init mimicking nn.Linear defaults (uniform +-1/sqrt(fan_in)).
    Weights are stored transposed relative to torch: (in_features, out_features)."""
    k1, k2, k3, k4 = jax.random.split(key, 4)
    bound1 = 1.0 / (d_model ** 0.5)
    bound2 = 1.0 / (d_ff ** 0.5)
    w1 = jax.random.uniform(k1, (d_model, d_ff), dtype, -bound1, bound1)
    b1 = jax.random.uniform(k2, (d_ff,), dtype, -bound1, bound1)
    w2 = jax.random.uniform(k3, (d_ff, d_model), dtype, -bound2, bound2)
    b2 = jax.random.uniform(k4, (d_model,), dtype, -bound2, bound2)
    return w1, b1, w2, b2


def _reference(x, w1, b1, w2, b2):
    """Pure-JAX reference with the same bf16-operand / f32-accumulate arithmetic."""
    xb = x.astype(jnp.bfloat16).astype(jnp.float32)
    w1b = w1.astype(jnp.bfloat16).astype(jnp.float32)
    w2b = w2.astype(jnp.bfloat16).astype(jnp.float32)
    h = jnp.maximum(xb @ w1b + b1, 0.0)
    return h.astype(jnp.bfloat16).astype(jnp.float32) @ w2b + b2


if __name__ == "__main__":
    # Small batch/seq with the module's default widths: (batch, seq, d_model).
    batch, seq, d_model, d_ff = 2, 8, 512, 2048

    key = jax.random.PRNGKey(0)
    kx, kp = jax.random.split(key)
    x = jax.random.normal(kx, (batch, seq, d_model), dtype=jnp.float32)
    w1, b1, w2, b2 = init_params(kp, d_model, d_ff)

    # Default tiling: tff=512 -> 4 reduction steps, exercising the
    # accumulator init / finalize path.
    out = feed_forward(x, w1, b1, w2, b2)
    out = jax.block_until_ready(out)

    ref = _reference(x, w1, b1, w2, b2)

    assert out.shape == (batch, seq, d_model)
    assert out.dtype == x.dtype
    max_err = float(jnp.max(jnp.abs(out.astype(jnp.float32) - ref)))
    assert jnp.allclose(out.astype(jnp.float32), ref, atol=2e-2, rtol=2e-2), max_err

    print("KERNEL_OK")
</pallas_src>

<mosaic_0001>
module attributes {stable_mosaic.version = 11 : i64} {
  func.func @_ffn_kernel(%arg0: i32, %arg1: i32, %arg2: memref<16x512xbf16, #tpu.memory_space<vmem>>, %arg3: memref<512x512xbf16, #tpu.memory_space<vmem>>, %arg4: memref<1x512xf32, #tpu.memory_space<vmem>>, %arg5: memref<512x512xbf16, #tpu.memory_space<vmem>>, %arg6: memref<1x512xf32, #tpu.memory_space<vmem>>, %arg7: memref<16x512xf32, #tpu.memory_space<vmem>>, %arg8: memref<16x512xf32, #tpu.memory_space<vmem>>) attributes {dimension_semantics = [#tpu.dimension_semantics<parallel>, #tpu.dimension_semantics<arbitrary>], iteration_bounds = array<i64: 1, 4>, scalar_prefetch = 0 : i64, scratch_operands = 1 : i64, tpu.core_type = #tpu.core_type<tc>, window_params = [{transform_indices = @transform_0, window_bounds = array<i64: 16, 512>}, {transform_indices = @transform_1, window_bounds = array<i64: 512, 512>}, {transform_indices = @transform_2, window_bounds = array<i64: 1, 512>}, {transform_indices = @transform_3, window_bounds = array<i64: 512, 512>}, {pipeline_mode = #tpu.pipeline_mode<synchronous>, transform_indices = @transform_4, window_bounds = array<i64: 1, 512>}, {transform_indices = @transform_5, window_bounds = array<i64: 16, 512>}]} {
    %c0_i32 = arith.constant 0 : i32
    %0 = arith.cmpi eq, %arg1, %c0_i32 : i32
    %1 = arith.extui %0 : i1 to i32
    %c0_i32_0 = arith.constant 0 : i32
    %2 = arith.cmpi ne, %1, %c0_i32_0 : i32
    scf.if %2 {
      %cst_15 = arith.constant 0.000000e+00 : f32
      %20 = vector.broadcast %cst_15 : f32 to vector<16x512xf32>
      %c0_16 = arith.constant 0 : index
      %c0_17 = arith.constant 0 : index
      %21 = vector.load %arg8[%c0_16, %c0_17] : memref<16x512xf32, #tpu.memory_space<vmem>>, vector<16x512xf32>
      tpu.vector_store %arg8[%c0_16, %c0_17], %20 {strides = array<i32>} : memref<16x512xf32, #tpu.memory_space<vmem>>, vector<16x512xf32>,
    } else {
    }
    %c0 = arith.constant 0 : index
    %c0_1 = arith.constant 0 : index
    %3 = vector.load %arg2[%c0, %c0_1] : memref<16x512xbf16, #tpu.memory_space<vmem>>, vector<16x512xbf16>
    %c0_2 = arith.constant 0 : index
    %c0_3 = arith.constant 0 : index
    %4 = vector.load %arg3[%c0_2, %c0_3] : memref<512x512xbf16, #tpu.memory_space<vmem>>, vector<512x512xbf16>
    %cst = arith.constant dense<0.000000e+00> : vector<16x512xf32>
    %5 = tpu.matmul %3, %4, %cst {dimension_numbers = #tpu.dot_dimension_numbers<[1], [0], [0], [1], [0, 0, 1, 1], [], []>} : vector<16x512xbf16>, vector<512x512xbf16>, vector<16x512xf32> -> vector<16x512xf32>
    %c0_4 = arith.constant 0 : index
    %c0_5 = arith.constant 0 : index
    %6 = vector.load %arg4[%c0_4, %c0_5] : memref<1x512xf32, #tpu.memory_space<vmem>>, vector<1x512xf32>
    %7 = vector.broadcast %6 : vector<1x512xf32> to vector<16x512xf32>
    %8 = arith.addf %5, %7 : vector<16x512xf32>
    %cst_6 = arith.constant 0.000000e+00 : f32
    %9 = vector.broadcast %cst_6 : f32 to vector<16x512xf32>
    %10 = arith.maximumf %8, %9 : vector<16x512xf32>
    %c0_7 = arith.constant 0 : index
    %c0_8 = arith.constant 0 : index
    %11 = vector.load %arg8[%c0_7, %c0_8] : memref<16x512xf32, #tpu.memory_space<vmem>>, vector<16x512xf32>
    %12 = arith.truncf %10 : vector<16x512xf32> to vector<16x512xbf16>
    %c0_9 = arith.constant 0 : index
    %c0_10 = arith.constant 0 : index
    %13 = vector.load %arg5[%c0_9, %c0_10] : memref<512x512xbf16, #tpu.memory_space<vmem>>, vector<512x512xbf16>
    %cst_11 = arith.constant dense<0.000000e+00> : vector<16x512xf32>
    %14 = tpu.matmul %12, %13, %cst_11 {dimension_numbers = #tpu.dot_dimension_numbers<[1], [0], [0], [1], [0, 0, 1, 1], [], []>} : vector<16x512xbf16>, vector<512x512xbf16>, vector<16x512xf32> -> vector<16x512xf32>
    %15 = arith.addf %11, %14 : vector<16x512xf32>
    %c0_12 = arith.constant 0 : index
    %c0_13 = arith.constant 0 : index
    %16 = vector.load %arg8[%c0_12, %c0_13] : memref<16x512xf32, #tpu.memory_space<vmem>>, vector<16x512xf32>
    tpu.vector_store %arg8[%c0_12, %c0_13], %15 {strides = array<i32>} : memref<16x512xf32, #tpu.memory_space<vmem>>, vector<16x512xf32>,
    %c3_i32 = arith.constant 3 : i32
    %17 = arith.cmpi eq, %arg1, %c3_i32 : i32
    %18 = arith.extui %17 : i1 to i32
    %c0_i32_14 = arith.constant 0 : i32
    %19 = arith.cmpi ne, %18, %c0_i32_14 : i32
    scf.if %19 {
      %c0_15 = arith.constant 0 : index
      %c0_16 = arith.constant 0 : index
      %20 = vector.load %arg8[%c0_15, %c0_16] : memref<16x512xf32, #tpu.memory_space<vmem>>, vector<16x512xf32>
      %c0_17 = arith.constant 0 : index
      %c0_18 = arith.constant 0 : index
      %21 = vector.load %arg6[%c0_17, %c0_18] : memref<1x512xf32, #tpu.memory_space<vmem>>, vector<1x512xf32>
      %22 = vector.broadcast %21 : vector<1x512xf32> to vector<16x512xf32>
      %23 = arith.addf %20, %22 : vector<16x512xf32>
      %c0_19 = arith.constant 0 : index
      %c0_20 = arith.constant 0 : index
      %24 = vector.load %arg7[%c0_19, %c0_20] : memref<16x512xf32, #tpu.memory_space<vmem>>, vector<16x512xf32>
      tpu.vector_store %arg7[%c0_19, %c0_20], %23 {strides = array<i32>} : memref<16x512xf32, #tpu.memory_space<vmem>>, vector<16x512xf32>,
    } else {
    }
    return
  }
  func.func @transform_0(%arg0: i32, %arg1: i32) -> (i32, i32) {
    %c0_i32 = arith.constant 0 : i32
    %c0_i32_0 = arith.constant 0 : i32
    return %arg0, %c0_i32 : i32, i32
  }
  func.func @transform_1(%arg0: i32, %arg1: i32) -> (i32, i32) {
    %c0_i32 = arith.constant 0 : i32
    %c0_i32_0 = arith.constant 0 : i32
    return %c0_i32, %arg1 : i32, i32
  }
  func.func @transform_2(%arg0: i32, %arg1: i32) -> (i32, i32) {
    %c0_i32 = arith.constant 0 : i32
    %c0_i32_0 = arith.constant 0 : i32
    return %c0_i32, %arg1 : i32, i32
  }
  func.func @transform_3(%arg0: i32, %arg1: i32) -> (i32, i32) {
    %c0_i32 = arith.constant 0 : i32
    %c0_i32_0 = arith.constant 0 : i32
    return %arg1, %c0_i32 : i32, i32
  }
  func.func @transform_4(%arg0: i32, %arg1: i32) -> (i32, i32) {
    %c0_i32 = arith.constant 0 : i32
    %c0_i32_0 = arith.constant 0 : i32
    %c0_i32_1 = arith.constant 0 : i32
    return %c0_i32, %c0_i32_0 : i32, i32
  }
  func.func @transform_5(%arg0: i32, %arg1: i32) -> (i32, i32) {
    %c0_i32 = arith.constant 0 : i32
    %c0_i32_0 = arith.constant 0 : i32
    return %arg0, %c0_i32 : i32, i32
  }
}

</mosaic_0001>

<bundles_post_ra>
// kernel: tpu_custom_call.1
= control target key start
LH: loop header
LB: loop body
LE: loop exit
PB: predicated region body
PF: predicated region fallthrough
CT: control target
= control target key end

     0   :  { %s4088_s0 = inlined_call_operand.hbm [shape: bf16[16,512], index: 0, kind: input, shape index: {}]   ;;  %s4089_s1 = inlined_call_operand.hbm [shape: bf16[512,2048], index: 1, kind: input, shape index: {}]   ;;  %s4090_s2 = inlined_call_operand.hbm [shape: f32[1,2048], index: 2, kind: input, shape index: {}]   ;;  %s4091_s3 = inlined_call_operand.hbm [shape: bf16[2048,512], index: 3, kind: input, shape index: {}]   ;;  %s4092_s4 = inlined_call_operand.hbm [shape: f32[1,512], index: 4, kind: input, shape index: {}]   ;;  %s4093_s5 = inlined_call_operand.hbm [shape: f32[16,512], index: 5, kind: output, shape index: {}]  }
   0x1   :  { %4097 = sst [smem:[#allocation19_spill]] %s4089_s1 }
   0x2   :  { %4098 = sst [smem:[#allocation20_spill]] %s4092_s4 }
   0x3   :  { %10 = vsyncpa [#allocation4], 0 }
   0x4   :  { %11 = vsyncpa [#allocation7], 0 }
   0x5   :  { %13 = vsyncpa [#allocation7 + $0x1], 0 }
   0x6   :  { %14 = vsyncpa [#allocation10], 0 }
   0x7   :  { %16 = vsyncpa [#allocation10 + $0x1], 0 }
   0x8   :  { %17 = vsyncpa [#allocation5], 0  ;;  %s3579_s18 = smov 0   ;;  %s3581_s19 = smov 0  }
   0x9   :  { %s3583_s20 = smov 0   ;;  %s3585_s21 = smov 0  }
   0xa   :  { %s3587_s22 = smov 0   ;;  %s3589_s23 = smov 0  }
   0xb LB: > { %s3608_s24 = sadd.s32 4294967295, %s3535_s23   ;;  %s68_s25 = sadd.s32 1, %s3523_s20  ;;  %s3535_s23 = sphi %s3589_s23, %s23_s23   ;;  %s3531_s22 = sphi %s3587_s22, %s4116_s22   ;;  %s3527_s21 = sphi %s3585_s21, %s4115_s21   ;;  %s3523_s20 = sphi %s3583_s20, %s4114_s20   ;;  %s3519_s19 = sphi %s3581_s19, %s4113_s19   ;;  %s3515_s18 = sphi %s3579_s18, %s4112_s18  }
   0xc   : > { %p75_p0 = scmp.ne.s32.totalorder %s3523_s20, %s3519_s19  ;;  %p76_p1 = scmp.eq.s32.totalorder %s3535_s23, 0 }
   0xd   : > { %p81_p2 = scmp.ne.s32.totalorder %s3519_s19, %s3515_s18  ;;  %p4094_p3 = scmp.eq.s32.totalorder %s3608_s24, 0 }
   0xe   : > { %p77_p4 = por %p76_p1, %p75_p0  ;;  %p2530_p5 = scmp.ge.s32.totalorder %s3535_s23, 1 }
   0xf   : > { %p3619_p6 = por %p4094_p3, %p81_p2  ;;  %p191_p7 = scmp.lt.s32.totalorder %s3535_s23, 5 }
  0x10   : > { %s3537_s28 = smov [#allocation11]   ;;  %p2857_p10 = scmp.lt.s32.totalorder %s3535_s23, 4 }
  0x11   : > { %p3624_p8 = pnand %p2530_p5, %p191_p7  ;;  %s221_s29 = sshll.u32 %s3537_s28, 4  ;;  %s222_s29 = int_to_ptr.vmem [resolvable:$true] %s221_s29 }
  0x12   : > { %p3637_p12 = pnand %p2857_p10, %p77_p4  ;;  %s3320_s7 = scalar_lea.vmem %s222_s29, 64 }
  0x13   : > { %p2838_p9 = pneg %p3624_p8  ;;  %p3321_p0 = scmp.ne.s32.totalorder %s222_s29, %s3320_s7 }
  0x14   : > { %p3328_p5 = scmp.lt.s32.totalorder %s222_s29, %s222_s29  ;;  %p3329_p7 = scmp.lt.s32.totalorder %s3320_s7, %s3320_s7 }
  0x15   : > { %p3633_p11 = pnand %p2838_p9, %p4094_p3 }
  0x16   : > { %p3330_p9 = por %p3329_p7, %p3328_p5 }
  0x17   : > { %p3311_p13 = pneg %p3633_p11 }
  0x19   : > { %p3323_p1 = pnand %p3321_p0, %p3311_p13 }
  0x1b   : > { %p3324_p2 = pneg %p3323_p1 }
  0x1d   : > { %p3331_p3 = pnand %p3330_p9, %p3324_p2 }
  0x1f   : > { %3334 = shalt.err (!%p3331_p3)
}
  0x20   : > { %s4103_s4 = sld [smem:[#allocation20_spill]]  ;;  %s32_s10 = sadd.s32 1, %s3531_s22 }
  0x21   : > { %s4095_s11 = sand.u32 1, %s3535_s23   ;;  %p33_p4 = scmp.ge.s32.totalorder %s32_s10, 4 }
  0x22   : > { %s234_s12 = sand.u32 1, %s3523_s20   ;;  %s2816_s13 = sshll.u32 %s3531_s22, 8 }
  0x23   : > { %s4118_s10 = smov (%p33_p4, %s32_s10), 0  ;;  %s3659_s14 = sshll.u32 %s234_s12, 10 }
  0x24   : > { %4104 = sst [smem:[#allocation18_spill]] %s4118_s10  ;;  %s65_s18 = ssub.s32 %s3531_s22, %s4118_s10 }
  0x25   : > { %s4105_s1 = sld [smem:[#allocation19_spill]]  ;;  %p66_p3 = scmp.eq.s32.totalorder %s65_s18, 0 }
  0x26   : > { %2844 = dma.hbm_to_vmem [thread:$0]  (!%p3633_p11), %s4103_s4, 64, %s222_s29, [#allocation10]  }
  0x27   : > { %s236_s28 = scalar_lea.vmem [#allocation6], %s3659_s14  ;;  %s3676_s8 = scalar_lea.sflag [#allocation7], %s4095_s11 }
  0x28   : > { %s243_s29 = sshll.u32 %s236_s28, 4  ;;  %p3337_p10 = pneg %p3637_p12  ;;  %s244_s29 = int_to_ptr.vmem [resolvable:$true] %s243_s29 }
  0x29   : > { %s3672_s7 = scalar_select %p66_p3, %s3523_s20, %s68_s25  }
  0x2a   : > { %s3348_s9 = scalar_lea.vmem %s244_s29, 16384 }
  0x2b   : > { %s3664_s17 = scalar_lea.hbm %s4105_s1, %s2816_s13  ;;  %p3349_p0 = scmp.ne.s32.totalorder %s244_s29, %s3348_s9 }
  0x2c   : > { %s3538_s13 = smov [#allocation6]  }
  0x2d   : > { %p3351_p1 = pnand %p3349_p0, %p3337_p10  ;;  %s3353_s15 = sshll.u32 %s3538_s13, 4  ;;  %s3354_s15 = int_to_ptr.vmem [resolvable:$false] %s3353_s15 }
  0x2e   : > { %s3355_s16 = scalar_lea.vmem %s3354_s15, 32768  ;;  %p3356_p5 = scmp.lt.s32.totalorder %s244_s29, %s3354_s15 }
  0x2f   : > { %p3352_p2 = pneg %p3351_p1  ;;  %p3357_p7 = scmp.lt.s32.totalorder %s3355_s16, %s3348_s9 }
  0x31   : > { %p3358_p9 = por %p3357_p7, %p3356_p5 }
  0x33   : > { %p3359_p4 = pnand %p3358_p9, %p3352_p2 }
  0x35   : > { %3362 = shalt.err (!%p3359_p4)
}
  0x36   : > { %s3539_s25 = smov 1024   ;;  %s3540_s18 = smov 256  }
  0x37   : > { %s3541_s28 = smov 16   ;;  %s3542_s13 = smov [#allocation3]  }
  0x38   : > { %2848 = dma.hbm_to_vmem [thread:$0]  (!%p3637_p12), %s3664_s17, 16384, %s244_s29, %s3676_s8, %s3539_s25, %s3540_s18, %s3541_s28  }
  0x39   : > { %s207_s11 = sshll.u32 %s3542_s13, 4  ;;  %s2537_s9 = sshll.u32 %s234_s12, 2  ;;  %s208_s11 = int_to_ptr.vmem [resolvable:$true] %s207_s11 }
  0x3a   : > { %s3374_s15 = scalar_lea.vmem %s208_s11, 512  ;;  %p3382_p2 = scmp.lt.s32.totalorder %s208_s11, %s208_s11 }
  0x3b   : > { %p3375_p3 = scmp.ne.s32.totalorder %s208_s11, %s3374_s15  ;;  %p3383_p5 = scmp.lt.s32.totalorder %s3374_s15, %s3374_s15 }
  0x3d   : > { %p3377_p0 = pnand %p3375_p3, %p3311_p13  ;;  %p3384_p7 = por %p3383_p5, %p3382_p2 }
  0x3f   : > { %p3378_p1 = pneg %p3377_p0 }
  0x41   : > { %p3385_p9 = pnand %p3384_p7, %p3378_p1 }
  0x43   : > { %3388 = shalt.err (!%p3385_p9)
}
  0x44   : > { %2841 = dma.hbm_to_vmem [thread:$0]  (!%p3633_p11), %s4088_s0, 512, %s208_s11, [#allocation4], %s3540_s18, %s3540_s18, %s3541_s28  }
  0x45   : > { %s2817_s12 = sshll.u32 %s3531_s22, 6  ;;  %s257_s15 = scalar_lea.vmem [#allocation8], %s2537_s9 }
  0x46   : > { %s263_s13 = scalar_lea.hbm %s4090_s2, %s2817_s12  ;;  %s265_s1 = sshll.u32 %s257_s15, 4  ;;  %s266_s1 = int_to_ptr.vmem [resolvable:$true] %s265_s1 }
  0x47   : > { %s3402_s4 = scalar_lea.vmem %s266_s1, 64  ;;  %s3543_s30 = smov [#allocation8]  }
  0x48   : > { %p3403_p13 = scmp.ne.s32.totalorder %s266_s1, %s3402_s4  ;;  %s3407_s10 = sshll.u32 %s3543_s30, 4  ;;  %s3408_s10 = int_to_ptr.vmem [resolvable:$false] %s3407_s10 }
  0x49   : > { %s3409_s17 = scalar_lea.vmem %s3408_s10, 128  ;;  %p3410_p0 = scmp.lt.s32.totalorder %s266_s1, %s3408_s10 }
  0x4a   : > { %p3405_p4 = pnand %p3403_p13, %p3337_p10  ;;  %p3411_p11 = scmp.lt.s32.totalorder %s3409_s17, %s3402_s4 }
  0x4c   : > { %p3406_p3 = pneg %p3405_p4  ;;  %p3412_p1 = por %p3411_p11, %p3410_p0 }
  0x4e   : > { %p3413_p2 = pnand %p3412_p1, %p3406_p3 }
  0x50   : > { %3416 = shalt.err (!%p3413_p2)
}
  0x51   : > { %2851 = dma.hbm_to_vmem [thread:$0]  (!%p3637_p12), %s263_s13, 64, %s266_s1, %s3676_s8  }
  0x52   : > { %s2819_s11 = sshll.u32 %s3531_s22, 14  ;;  %s276_s16 = scalar_lea.vmem [#allocation9], %s3659_s14 }
  0x53   : > { %s283_s12 = scalar_lea.hbm %s4091_s3, %s2819_s11  ;;  %s284_s25 = sshll.u32 %s276_s16, 4  ;;  %s285_s25 = int_to_ptr.vmem [resolvable:$true] %s284_s25 }
  0x54   : > { %s4106_s4 = sand.u32 1, %s3535_s23   ;;  %s3430_s15 = scalar_lea.vmem %s285_s25, 16384 }
  0x55   : > { %s273_s10 = scalar_lea.sflag [#allocation10], %s4106_s4  ;;  %p3431_p5 = scmp.ne.s32.totalorder %s285_s25, %s3430_s15 }
  0x56   : > { %s3544_s30 = smov [#allocation9]  }
  0x57   : > { %p3433_p7 = pnand %p3431_p5, %p3337_p10  ;;  %s3435_s17 = sshll.u32 %s3544_s30, 4  ;;  %s3436_s17 = int_to_ptr.vmem [resolvable:$false] %s3435_s17 }
  0x58   : > { %s3437_s1 = scalar_lea.vmem %s3436_s17, 32768  ;;  %p3438_p13 = scmp.lt.s32.totalorder %s285_s25, %s3436_s17 }
  0x59   : > { %p3434_p9 = pneg %p3433_p7  ;;  %p3439_p4 = scmp.lt.s32.totalorder %s3437_s1, %s3430_s15 }
  0x5b   : > { %p3440_p3 = por %p3439_p4, %p3438_p13 }
  0x5d   : > { %p3441_p0 = pnand %p3440_p3, %p3434_p9 }
  0x5f   : > { %3444 = shalt.err (!%p3441_p0)
}
  0x60   : > { %2854 = dma.hbm_to_vmem [thread:$0]  (!%p3637_p12), %s283_s12, 16384, %s285_s25, %s273_s10, %s3540_s18, %s3540_s18, %s3541_s28  }
  0x61   : > { %296 = sbr.rel (%p3624_p8) target bundleno = 756 (0x2f4), region = 40  ;;  %p4107_p10 = scmp.eq.s32.totalorder (!%p3624_p8), %s3608_s24, 0 }
  0x66   : > { %3494 = dma.done.wait (%p4107_p10), [#allocation4], 512   ;;  %p4108_p11 = pmov %p4107_p10 }
  0x67   : > { %s302_s14 = sand.u32 1, %s3608_s24   ;;  %s304_s8 = sand.u32 1, %s3519_s19  }
  0x68   : > { %3496 = vsyncadd (%p4108_p11), [#allocation4], 4294966784  ;;  %s2546_s13 = sshll.u32 %s304_s8, 10  ;;  %s303_s6 = scalar_lea.sflag [#allocation7], %s302_s14 }
  0x69   : > { %s3735_s11 = scalar_lea.vmem [#allocation6], %s2546_s13 }
  0x6a   : > { %3498 = dma.done.wait (%p3619_p6), %s303_s6, 16448  }
  0x6b   : > { %3500 = vsyncadd (%p3619_p6), %s303_s6, 4294950848  ;;  %s3741_s27 = sshll.u32 %s304_s8, 2  ;;  %s321_s28 = scalar_lea.sflag [#allocation10], %s302_s14 }
  0x6c   : > { %s315_s18 = scalar_lea.vmem [#allocation8], %s3741_s27  ;;  %s3744_s9 = scalar_lea.vmem [#allocation9], %s2546_s13 }
  0x6d   : > { %3502 = dma.done.wait (%p3619_p6), %s321_s28, 16384  }
  0x6e   : > { %3504 = vsyncadd (%p3619_p6), %s321_s28, 4294950912  ;;  %p4109_p8 = pmov %p4107_p10 }
  0x70   : > { %3506 = dma.done.wait (%p4109_p8), [#allocation10], 64   ;;  %p4110_p12 = pmov %p4109_p8 }
  0x71   : > { %p2550_p1 = scmp.ne.s32.totalorder %s3527_s21, 0 }
  0x72   : > { %3508 = vsyncadd (%p4110_p12), [#allocation10], 4294967232 }
  0x73   : > { %368 = sbr.rel (%p2550_p1) target bundleno = 125 (0x7d), region = 64 }
  0x78   : > { %v3545_v0 = vmov 0.0  }
  0x79   : > { %369 = vst [vmem:[#allocation2 + $0x30] sm:$0xff] %v3545_v0  ;;  %370 = vst [vmem:[#allocation2] sm:$0xff] %v3545_v0 }
  0x7a   : > { %371 = vst [vmem:[#allocation2 + $0x18] sm:$0xff] %v3545_v0  ;;  %372 = vst [vmem:[#allocation2 + $0x10] sm:$0xff] %v3545_v0 }
  0x7b   : > { %373 = vst [vmem:[#allocation2 + $0x8] sm:$0xff] %v3545_v0  ;;  %374 = vst [vmem:[#allocation2 + $0x20] sm:$0xff] %v3545_v0 }
  0x7c   : > { %375 = vst [vmem:[#allocation2 + $0x28] sm:$0xff] %v3545_v0  ;;  %376 = vst [vmem:[#allocation2 + $0x38] sm:$0xff] %v3545_v0 }
  0x7d PF: > { %v2919_v1 = vld [vmem:[%s3735_s11 + $0xe4] ss:$16 sps:$4 sm:$0xff]   ;;  %v2923_v3 = vld [vmem:[%s3735_s11 + $0xe0] ss:$16 sps:$4 sm:$0xff]   ;;  %v3020_v52 = vld [vmem:[#allocation3 + $0xc] ss:$16 sps:$4 sm:$0xff]  }
  0x7e   : > { %v2921_v2 = vld [vmem:[%s3735_s11 + $0x2e4] ss:$16 sps:$4 sm:$0xff]   ;;  %1191 = vmatprep.subr.bf16.mxu0 %v2919_v1  ;;  %v2924_v4 = vld [vmem:[%s3735_s11 + $0x2e0] ss:$16 sps:$4 sm:$0xff]   ;;  %1266 = vmatprep.mubr.bf16.mxu1 %v3020_v52  ;;  %p2811_p6 = scmp.ne.s32.totalorder %s3527_s21, 3 }
  0x7f   : > { %1234 = vmatprep.subr.bf16.mxu1 %v2921_v2  ;;  %v2925_v5 = vld [vmem:[%s3735_s11 + $0xc4] ss:$16 sps:$4 sm:$0xff]   ;;  %1192 = vmatpush1.bf16.msra.mxu0 %v2923_v3  ;;  %v2929_v7 = vld [vmem:[%s3735_s11 + $0xc0] ss:$16 sps:$4 sm:$0xff]   ;;  %v3023_v3 = vld [vmem:[%s3735_s11 + $0xec] ss:$16 sps:$4 sm:$0xff]  }
  0x80   : > { %1235 = vmatpush1.bf16.msra.mxu1 %v2924_v4  ;;  %v2927_v6 = vld [vmem:[%s3735_s11 + $0x2c4] ss:$16 sps:$4 sm:$0xff]   ;;  %1193 = vmatprep.subr.bf16.mxu0 %v2925_v5  ;;  %v2930_v8 = vld [vmem:[%s3735_s11 + $0x2c0] ss:$16 sps:$4 sm:$0xff]   ;;  %v3026_v4 = vld [vmem:[%s3735_s11 + $0x2ec] ss:$16 sps:$4 sm:$0xff]  }
  0x81   : > { %1236 = vmatprep.subr.bf16.mxu1 %v2927_v6  ;;  %v2931_v9 = vld [vmem:[%s3735_s11 + $0xa4] ss:$16 sps:$4 sm:$0xff]   ;;  %v2935_v11 = vld [vmem:[%s3735_s11 + $0xa0] ss:$16 sps:$4 sm:$0xff]   ;;  %v3823_v6 = vld [vmem:[#allocation3 + $0x8] ss:$16 sps:$4 sm:$0xff]  }
  0x82   : > { %v2933_v10 = vld [vmem:[%s3735_s11 + $0x2a4] ss:$16 sps:$4 sm:$0xff]   ;;  %v2936_v12 = vld [vmem:[%s3735_s11 + $0x2a0] ss:$16 sps:$4 sm:$0xff]  }
  0x83   : > { %1194 = vmatpush1.bf16.msra.mxu0 %v2929_v7  ;;  %v2937_v13 = vld [vmem:[%s3735_s11 + $0x84] ss:$16 sps:$4 sm:$0xff]   ;;  %v2941_v15 = vld [vmem:[%s3735_s11 + $0x80] ss:$16 sps:$4 sm:$0xff]   ;;  %v3021_v7 = vld [vmem:[%s3735_s11 + $0xe8] ss:$16 sps:$4 sm:$0xff]  }
  0x84   : > { %1237 = vmatpush1.bf16.msra.mxu1 %v2930_v8  ;;  %1195 = vmatprep.subr.bf16.mxu0 %v2931_v9  ;;  %v2939_v14 = vld [vmem:[%s3735_s11 + $0x284] ss:$16 sps:$4 sm:$0xff]   ;;  %v2942_v16 = vld [vmem:[%s3735_s11 + $0x280] ss:$16 sps:$4 sm:$0xff]   ;;  %v3024_v8 = vld [vmem:[%s3735_s11 + $0x2e8] ss:$16 sps:$4 sm:$0xff]  }
  0x85   : > { %1238 = vmatprep.subr.bf16.mxu1 %v2933_v10  ;;  %v2943_v17 = vld [vmem:[%s3735_s11 + $0x64] ss:$16 sps:$4 sm:$0xff]   ;;  %v2947_v19 = vld [vmem:[%s3735_s11 + $0x60] ss:$16 sps:$4 sm:$0xff]   ;;  %v3029_v9 = vld [vmem:[%s3735_s11 + $0xcc] ss:$16 sps:$4 sm:$0xff]  }
  0x86   : > { %v2945_v18 = vld [vmem:[%s3735_s11 + $0x264] ss:$16 sps:$4 sm:$0xff]   ;;  %v2948_v20 = vld [vmem:[%s3735_s11 + $0x260] ss:$16 sps:$4 sm:$0xff]   ;;  %v3032_v10 = vld [vmem:[%s3735_s11 + $0x2cc] ss:$16 sps:$4 sm:$0xff]  }
  0x87   : > { %1196 = vmatpush1.bf16.msra.mxu0 %v2935_v11  ;;  %v2949_v21 = vld [vmem:[%s3735_s11 + $0x44] ss:$16 sps:$4 sm:$0xff]   ;;  %v2953_v23 = vld [vmem:[%s3735_s11 + $0x40] ss:$16 sps:$4 sm:$0xff]   ;;  %v3027_v11 = vld [vmem:[%s3735_s11 + $0xc8] ss:$16 sps:$4 sm:$0xff]  }
  0x88   : > { %1239 = vmatpush1.bf16.msra.mxu1 %v2936_v12  ;;  %1197 = vmatprep.subr.bf16.mxu0 %v2937_v13  ;;  %v2951_v22 = vld [vmem:[%s3735_s11 + $0x244] ss:$16 sps:$4 sm:$0xff]   ;;  %v2954_v24 = vld [vmem:[%s3735_s11 + $0x240] ss:$16 sps:$4 sm:$0xff]   ;;  %v3030_v12 = vld [vmem:[%s3735_s11 + $0x2c8] ss:$16 sps:$4 sm:$0xff]  }
  0x89   : > { %1240 = vmatprep.subr.bf16.mxu1 %v2939_v14  ;;  %v2955_v25 = vld [vmem:[%s3735_s11 + $0x24] ss:$16 sps:$4 sm:$0xff]   ;;  %v2959_v27 = vld [vmem:[%s3735_s11 + $0x20] ss:$16 sps:$4 sm:$0xff]   ;;  %v3035_v13 = vld [vmem:[%s3735_s11 + $0xac] ss:$16 sps:$4 sm:$0xff]  }
  0x8a   : > { %v2957_v26 = vld [vmem:[%s3735_s11 + $0x224] ss:$16 sps:$4 sm:$0xff]   ;;  %v2960_v28 = vld [vmem:[%s3735_s11 + $0x220] ss:$16 sps:$4 sm:$0xff]   ;;  %v3038_v14 = vld [vmem:[%s3735_s11 + $0x2ac] ss:$16 sps:$4 sm:$0xff]  }
  0x8b   : > { %1198 = vmatpush1.bf16.msra.mxu0 %v2941_v15  ;;  %v2961_v29 = vld [vmem:[%s3735_s11 + $0x4] ss:$16 sps:$4 sm:$0xff]   ;;  %v2965_v31 = vld [vmem:[%s3735_s11] ss:$16 sps:$4 sm:$0xff]   ;;  %v3033_v15 = vld [vmem:[%s3735_s11 + $0xa8] ss:$16 sps:$4 sm:$0xff]  }
  0x8c   : > { %1241 = vmatpush1.bf16.msra.mxu1 %v2942_v16  ;;  %1199 = vmatprep.subr.bf16.mxu0 %v2943_v17  ;;  %v2963_v30 = vld [vmem:[%s3735_s11 + $0x204] ss:$16 sps:$4 sm:$0xff]   ;;  %v2966_v32 = vld [vmem:[%s3735_s11 + $0x200] ss:$16 sps:$4 sm:$0xff]   ;;  %v3036_v16 = vld [vmem:[%s3735_s11 + $0x2a8] ss:$16 sps:$4 sm:$0xff]  }
  0x8d   : > { %1242 = vmatprep.subr.bf16.mxu1 %v2945_v18  ;;  %v2967_v33 = vld [vmem:[%s3735_s11 + $0x1e4] ss:$16 sps:$4 sm:$0xff]   ;;  %v2971_v35 = vld [vmem:[%s3735_s11 + $0x1e0] ss:$16 sps:$4 sm:$0xff]   ;;  %v3041_v17 = vld [vmem:[%s3735_s11 + $0x8c] ss:$16 sps:$4 sm:$0xff]  }
  0x8e   : > { %v2969_v34 = vld [vmem:[%s3735_s11 + $0x3e4] ss:$16 sps:$4 sm:$0xff]   ;;  %v2972_v36 = vld [vmem:[%s3735_s11 + $0x3e0] ss:$16 sps:$4 sm:$0xff]   ;;  %v3044_v18 = vld [vmem:[%s3735_s11 + $0x28c] ss:$16 sps:$4 sm:$0xff]  }
  0x8f   : > { %1200 = vmatpush1.bf16.msra.mxu0 %v2947_v19  ;;  %v2973_v37 = vld [vmem:[%s3735_s11 + $0x1c4] ss:$16 sps:$4 sm:$0xff]   ;;  %v2977_v39 = vld [vmem:[%s3735_s11 + $0x1c0] ss:$16 sps:$4 sm:$0xff]   ;;  %v3039_v19 = vld [vmem:[%s3735_s11 + $0x88] ss:$16 sps:$4 sm:$0xff]  }
  0x90   : > { %1243 = vmatpush1.bf16.msra.mxu1 %v2948_v20  ;;  %1201 = vmatprep.subr.bf16.mxu0 %v2949_v21  ;;  %v2975_v38 = vld [vmem:[%s3735_s11 + $0x3c4] ss:$16 sps:$4 sm:$0xff]   ;;  %v2978_v40 = vld [vmem:[%s3735_s11 + $0x3c0] ss:$16 sps:$4 sm:$0xff]   ;;  %v3042_v20 = vld [vmem:[%s3735_s11 + $0x288] ss:$16 sps:$4 sm:$0xff]  }
  0x91   : > { %1244 = vmatprep.subr.bf16.mxu1 %v2951_v22  ;;  %v2979_v41 = vld [vmem:[%s3735_s11 + $0x1a4] ss:$16 sps:$4 sm:$0xff]   ;;  %v2983_v43 = vld [vmem:[%s3735_s11 + $0x1a0] ss:$16 sps:$4 sm:$0xff]   ;;  %v3047_v21 = vld [vmem:[%s3735_s11 + $0x6c] ss:$16 sps:$4 sm:$0xff]  }
  0x92   : > { %v2981_v42 = vld [vmem:[%s3735_s11 + $0x3a4] ss:$16 sps:$4 sm:$0xff]   ;;  %v2984_v44 = vld [vmem:[%s3735_s11 + $0x3a0] ss:$16 sps:$4 sm:$0xff]   ;;  %v3050_v22 = vld [vmem:[%s3735_s11 + $0x26c] ss:$16 sps:$4 sm:$0xff]  }
  0x93   : > { %1202 = vmatpush1.bf16.msra.mxu0 %v2953_v23  ;;  %v2985_v45 = vld [vmem:[%s3735_s11 + $0x184] ss:$16 sps:$4 sm:$0xff]   ;;  %v2989_v47 = vld [vmem:[%s3735_s11 + $0x180] ss:$16 sps:$4 sm:$0xff]   ;;  %v3045_v23 = vld [vmem:[%s3735_s11 + $0x68] ss:$16 sps:$4 sm:$0xff]  }
  0x94   : > { %1245 = vmatpush1.bf16.msra.mxu1 %v2954_v24  ;;  %1203 = vmatprep.subr.bf16.mxu0 %v2955_v25  ;;  %v2987_v46 = vld [vmem:[%s3735_s11 + $0x384] ss:$16 sps:$4 sm:$0xff]   ;;  %v2990_v48 = vld [vmem:[%s3735_s11 + $0x380] ss:$16 sps:$4 sm:$0xff]   ;;  %v3048_v24 = vld [vmem:[%s3735_s11 + $0x268] ss:$16 sps:$4 sm:$0xff]  }
  0x95   : > { %1246 = vmatprep.subr.bf16.mxu1 %v2957_v26  ;;  %v2991_v49 = vld [vmem:[%s3735_s11 + $0x164] ss:$16 sps:$4 sm:$0xff]   ;;  %v2995_v53 = vld [vmem:[%s3735_s11 + $0x160] ss:$16 sps:$4 sm:$0xff]   ;;  %v3053_v25 = vld [vmem:[%s3735_s11 + $0x4c] ss:$16 sps:$4 sm:$0xff]  }
  0x96   : > { %v3017_v50 = vld [vmem:[#allocation3 + $0x4] ss:$16 sps:$4 sm:$0xff]   ;;  %v2996_v54 = vld [vmem:[%s3735_s11 + $0x360] ss:$16 sps:$4 sm:$0xff]   ;;  %v3056_v26 = vld [vmem:[%s3735_s11 + $0x24c] ss:$16 sps:$4 sm:$0xff]  }
  0x97   : > { %1204 = vmatpush1.bf16.msra.mxu0 %v2959_v27  ;;  %v2993_v51 = vld [vmem:[%s3735_s11 + $0x364] ss:$16 sps:$4 sm:$0xff]   ;;  %1223 = vmatprep.mubr.bf16.mxu0 %v3017_v50  ;;  %v3001_v57 = vld [vmem:[%s3735_s11 + $0x140] ss:$16 sps:$4 sm:$0xff]   ;;  %v3051_v27 = vld [vmem:[%s3735_s11 + $0x48] ss:$16 sps:$4 sm:$0xff]  }
  0x98   : > { %1247 = vmatpush1.bf16.msra.mxu1 %v2960_v28  ;;  %1205 = vmatprep.subr.bf16.mxu0 %v2961_v29  ;;  %v2997_v55 = vld [vmem:[%s3735_s11 + $0x144] ss:$16 sps:$4 sm:$0xff]   ;;  %v3002_v58 = vld [vmem:[%s3735_s11 + $0x340] ss:$16 sps:$4 sm:$0xff]   ;;  %v3054_v28 = vld [vmem:[%s3735_s11 + $0x248] ss:$16 sps:$4 sm:$0xff]  }
  0x99   : > { %1248 = vmatprep.subr.bf16.mxu1 %v2963_v30  ;;  %v2999_v56 = vld [vmem:[%s3735_s11 + $0x344] ss:$16 sps:$4 sm:$0xff]   ;;  %v3007_v61 = vld [vmem:[%s3735_s11 + $0x120] ss:$16 sps:$4 sm:$0xff]   ;;  %v3059_v29 = vld [vmem:[%s3735_s11 + $0x2c] ss:$16 sps:$4 sm:$0xff]  }
  0x9a   : > { %v3003_v59 = vld [vmem:[%s3735_s11 + $0x124] ss:$16 sps:$4 sm:$0xff]   ;;  %v3008_v62 = vld [vmem:[%s3735_s11 + $0x320] ss:$16 sps:$4 sm:$0xff]   ;;  %v3062_v30 = vld [vmem:[%s3735_s11 + $0x22c] ss:$16 sps:$4 sm:$0xff]  }
  0x9b   : > { %1206 = vmatpush1.bf16.msra.mxu0 %v2965_v31  ;;  %v3005_v60 = vld [vmem:[%s3735_s11 + $0x324] ss:$16 sps:$4 sm:$0xff]   ;;  %v3013_v1 = vld [vmem:[%s3735_s11 + $0x100] ss:$16 sps:$4 sm:$0xff]   ;;  %v3057_v31 = vld [vmem:[%s3735_s11 + $0x28] ss:$16 sps:$4 sm:$0xff]  }
  0x9c   : > { %1249 = vmatpush1.bf16.msra.mxu1 %v2966_v32  ;;  %1207 = vmatprep.subr.bf16.mxu0 %v2967_v33  ;;  %v3009_v63 = vld [vmem:[%s3735_s11 + $0x104] ss:$16 sps:$4 sm:$0xff]   ;;  %v3014_v2 = vld [vmem:[%s3735_s11 + $0x300] ss:$16 sps:$4 sm:$0xff]   ;;  %v3060_v32 = vld [vmem:[%s3735_s11 + $0x228] ss:$16 sps:$4 sm:$0xff]  }
  0x9d   : > { %1250 = vmatprep.subr.bf16.mxu1 %v2969_v34  ;;  %v3011_v0 = vld [vmem:[%s3735_s11 + $0x304] ss:$16 sps:$4 sm:$0xff]   ;;  %v3821_v5 = vld [vmem:[#allocation3] ss:$16 sps:$4 sm:$0xff]   ;;  %v3065_v33 = vld [vmem:[%s3735_s11 + $0xc] ss:$16 sps:$4 sm:$0xff]  }
  0x9e   : > { %v3068_v34 = vld [vmem:[%s3735_s11 + $0x20c] ss:$16 sps:$4 sm:$0xff]  }
  0x9f   : > { %1208 = vmatpush2.bf16.msra.mxu0 %v2971_v35  ;;  %v3063_v35 = vld [vmem:[%s3735_s11 + $0x8] ss:$16 sps:$4 sm:$0xff]  }
  0xa0   : > { %1251 = vmatpush2.bf16.msra.mxu1 %v2972_v36  ;;  %1209 = vmatprep.subr.bf16.mxu0 %v2973_v37  ;;  %v3066_v36 = vld [vmem:[%s3735_s11 + $0x208] ss:$16 sps:$4 sm:$0xff]   ;;  %v3071_v37 = vld [vmem:[%s3735_s11 + $0x1ec] ss:$16 sps:$4 sm:$0xff]  }
  0xa1   : > { %1252 = vmatprep.subr.bf16.mxu1 %v2975_v38  ;;  %v3074_v38 = vld [vmem:[%s3735_s11 + $0x3ec] ss:$16 sps:$4 sm:$0xff]  }
  0xa3   : > { %1210 = vmatpush2.bf16.msra.mxu0 %v2977_v39  ;;  %v3069_v39 = vld [vmem:[%s3735_s11 + $0x1e8] ss:$16 sps:$4 sm:$0xff]  }
  0xa4   : > { %1253 = vmatpush2.bf16.msra.mxu1 %v2978_v40  ;;  %1211 = vmatprep.subr.bf16.mxu0 %v2979_v41  ;;  %v3072_v40 = vld [vmem:[%s3735_s11 + $0x3e8] ss:$16 sps:$4 sm:$0xff]   ;;  %v3077_v41 = vld [vmem:[%s3735_s11 + $0x1cc] ss:$16 sps:$4 sm:$0xff]  }
  0xa5   : > { %1254 = vmatprep.subr.bf16.mxu1 %v2981_v42  ;;  %v3080_v42 = vld [vmem:[%s3735_s11 + $0x3cc] ss:$16 sps:$4 sm:$0xff]  }
  0xa7   : > { %1212 = vmatpush2.bf16.msra.mxu0 %v2983_v43  ;;  %v3075_v43 = vld [vmem:[%s3735_s11 + $0x1c8] ss:$16 sps:$4 sm:$0xff]  }
  0xa8   : > { %1255 = vmatpush2.bf16.msra.mxu1 %v2984_v44  ;;  %1213 = vmatprep.subr.bf16.mxu0 %v2985_v45  ;;  %v3078_v44 = vld [vmem:[%s3735_s11 + $0x3c8] ss:$16 sps:$4 sm:$0xff]   ;;  %v3083_v45 = vld [vmem:[%s3735_s11 + $0x1ac] ss:$16 sps:$4 sm:$0xff]  }
  0xa9   : > { %1256 = vmatprep.subr.bf16.mxu1 %v2987_v46  ;;  %v3086_v46 = vld [vmem:[%s3735_s11 + $0x3ac] ss:$16 sps:$4 sm:$0xff]  }
  0xab   : > { %1214 = vmatpush2.bf16.msra.mxu0 %v2989_v47  ;;  %v3081_v47 = vld [vmem:[%s3735_s11 + $0x1a8] ss:$16 sps:$4 sm:$0xff]  }
  0xac   : > { %1257 = vmatpush2.bf16.msra.mxu1 %v2990_v48  ;;  %1215 = vmatprep.subr.bf16.mxu0 %v2991_v49  ;;  %v3084_v48 = vld [vmem:[%s3735_s11 + $0x3a8] ss:$16 sps:$4 sm:$0xff]   ;;  %v3089_v49 = vld [vmem:[%s3735_s11 + $0x18c] ss:$16 sps:$4 sm:$0xff]  }
  0xad   : > { %1258 = vmatprep.subr.bf16.mxu1 %v2993_v51  ;;  %v3087_v51 = vld [vmem:[%s3735_s11 + $0x188] ss:$16 sps:$4 sm:$0xff]  }
  0xaf   : > { %1216 = vmatpush2.bf16.msra.mxu0 %v2995_v53  ;;  %v3095_v53 = vld [vmem:[%s3735_s11 + $0x16c] ss:$16 sps:$4 sm:$0xff]  }
  0xb0   : > { %1259 = vmatpush2.bf16.msra.mxu1 %v2996_v54  ;;  %1217 = vmatprep.subr.bf16.mxu0 %v2997_v55  ;;  %v3098_v54 = vld [vmem:[%s3735_s11 + $0x36c] ss:$16 sps:$4 sm:$0xff]   ;;  %v3093_v55 = vld [vmem:[%s3735_s11 + $0x168] ss:$16 sps:$4 sm:$0xff]  }
  0xb1   : > { %1260 = vmatprep.subr.bf16.mxu1 %v2999_v56  ;;  %v3096_v56 = vld [vmem:[%s3735_s11 + $0x368] ss:$16 sps:$4 sm:$0xff]  }
  0xb3   : > { %1218 = vmatpush2.bf16.msra.mxu0 %v3001_v57  ;;  %v3101_v57 = vld [vmem:[%s3735_s11 + $0x14c] ss:$16 sps:$4 sm:$0xff]  }
  0xb4   : > { %1261 = vmatpush2.bf16.msra.mxu1 %v3002_v58  ;;  %1219 = vmatprep.subr.bf16.mxu0 %v3003_v59  ;;  %v3104_v58 = vld [vmem:[%s3735_s11 + $0x34c] ss:$16 sps:$4 sm:$0xff]   ;;  %v3099_v59 = vld [vmem:[%s3735_s11 + $0x148] ss:$16 sps:$4 sm:$0xff]  }
  0xb5   : > { %1262 = vmatprep.subr.bf16.mxu1 %v3005_v60  ;;  %v3102_v60 = vld [vmem:[%s3735_s11 + $0x348] ss:$16 sps:$4 sm:$0xff]  }
  0xb7   : > { %1220 = vmatpush2.bf16.msra.mxu0 %v3007_v61  ;;  %v3107_v61 = vld [vmem:[%s3735_s11 + $0x12c] ss:$16 sps:$4 sm:$0xff]  }
  0xb8   : > { %1263 = vmatpush2.bf16.msra.mxu1 %v3008_v62  ;;  %1221 = vmatprep.subr.bf16.mxu0 %v3009_v63  ;;  %v3110_v62 = vld [vmem:[%s3735_s11 + $0x32c] ss:$16 sps:$4 sm:$0xff]   ;;  %v3105_v63 = vld [vmem:[%s3735_s11 + $0x128] ss:$16 sps:$4 sm:$0xff]  }
  0xb9   : > { %1264 = vmatprep.subr.bf16.mxu1 %v3011_v0  ;;  %v3108_v0 = vld [vmem:[%s3735_s11 + $0x328] ss:$16 sps:$4 sm:$0xff]  }
  0xbb   : > { %1222 = vmatpush2.bf16.msra.mxu0 %v3013_v1  ;;  %v3113_v1 = vld [vmem:[%s3735_s11 + $0x10c] ss:$16 sps:$4 sm:$0xff]  }
  0xbc   : > { %1265 = vmatpush2.bf16.msra.mxu1 %v3014_v2  ;;  %1277 = vmatprep.subr.bf16.mxu0 %v3023_v3  ;;  %v3116_v2 = vld [vmem:[%s3735_s11 + $0x30c] ss:$16 sps:$4 sm:$0xff]   ;;  %v3111_v3 = vld [vmem:[%s3735_s11 + $0x108] ss:$16 sps:$4 sm:$0xff]  }
  0xbd   : > { %1320 = vmatprep.subr.bf16.mxu1 %v3026_v4  ;;  %v3114_v4 = vld [vmem:[%s3735_s11 + $0x308] ss:$16 sps:$4 sm:$0xff]  }
  0xbe   : > { %1224 = vmatmul.mubr.bf16.vlgmr.msra.gmra.mxu0 %v3821_v5 }
  0xbf   : > { %1267 = vmatmul.mubr.bf16.vlgmr.msra.gmra.mxu1 %v3823_v6  ;;  %1278 = vmatpush1.bf16.msra.mxu0 %v3021_v7  ;;  %v3119_v7 = vld [vmem:[%s3744_s9 + $0xe4] ss:$16 sps:$4 sm:$0xff]  }
  0xc0   : > { %1321 = vmatpush1.bf16.msra.mxu1 %v3024_v8  ;;  %1279 = vmatprep.subr.bf16.mxu0 %v3029_v9  ;;  %v3117_v8 = vld [vmem:[%s3744_s9 + $0xe0] ss:$16 sps:$4 sm:$0xff]   ;;  %v3122_v9 = vld [vmem:[%s3744_s9 + $0xc4] ss:$16 sps:$4 sm:$0xff]  }
  0xc1   : > { %1322 = vmatprep.subr.bf16.mxu1 %v3032_v10  ;;  %1309 = vmatprep.mubr.bf16.mxu0 %v3017_v50  ;;  %v3092_v50 = vld [vmem:[%s3735_s11 + $0x38c] ss:$16 sps:$4 sm:$0xff]   ;;  %v3120_v10 = vld [vmem:[%s3744_s9 + $0xc0] ss:$16 sps:$4 sm:$0xff]  }
  0xc2   : > { %1352 = vmatprep.mubr.bf16.mxu1 %v3020_v52  ;;  %v3090_v52 = vld [vmem:[%s3735_s11 + $0x388] ss:$16 sps:$4 sm:$0xff]  }
  0xc3   : > { %1280 = vmatpush1.bf16.msra.mxu0 %v3027_v11  ;;  %v3125_v11 = vld [vmem:[%s3744_s9 + $0xa4] ss:$16 sps:$4 sm:$0xff]  }
  0xc4   : > { %1323 = vmatpush1.bf16.msra.mxu1 %v3030_v12  ;;  %1281 = vmatprep.subr.bf16.mxu0 %v3035_v13  ;;  %v3123_v12 = vld [vmem:[%s3744_s9 + $0xa0] ss:$16 sps:$4 sm:$0xff]   ;;  %v3128_v13 = vld [vmem:[%s3744_s9 + $0x84] ss:$16 sps:$4 sm:$0xff]  }
  0xc5   : > { %1324 = vmatprep.subr.bf16.mxu1 %v3038_v14  ;;  %v3126_v14 = vld [vmem:[%s3744_s9 + $0x80] ss:$16 sps:$4 sm:$0xff]  }
  0xc7   : > { %1282 = vmatpush1.bf16.msra.mxu0 %v3033_v15  ;;  %v3167_v15 = vld [vmem:[%s3744_s9 + $0x2e4] ss:$16 sps:$4 sm:$0xff]  }
  0xc8   : > { %1325 = vmatpush1.bf16.msra.mxu1 %v3036_v16  ;;  %1283 = vmatprep.subr.bf16.mxu0 %v3041_v17  ;;  %v3134_v16 = vld [vmem:[%s3744_s9 + $0x44] ss:$16 sps:$4 sm:$0xff]   ;;  %v3165_v17 = vld [vmem:[%s3744_s9 + $0x2e0] ss:$16 sps:$4 sm:$0xff]  }
  0xc9   : > { %1326 = vmatprep.subr.bf16.mxu1 %v3044_v18  ;;  %v3132_v18 = vld [vmem:[%s3744_s9 + $0x40] ss:$16 sps:$4 sm:$0xff]  }
  0xcb   : > { %1284 = vmatpush1.bf16.msra.mxu0 %v3039_v19  ;;  %v3171_v19 = vld [vmem:[%s3744_s9 + $0x2c0] ss:$16 sps:$4 sm:$0xff]  }
  0xcc   : > { %1327 = vmatpush1.bf16.msra.mxu1 %v3042_v20  ;;  %1285 = vmatprep.subr.bf16.mxu0 %v3047_v21  ;;  %v3173_v20 = vld [vmem:[%s3744_s9 + $0x2c4] ss:$16 sps:$4 sm:$0xff]  }
  0xcd   : > { %1328 = vmatprep.subr.bf16.mxu1 %v3050_v22  ;;  %v3137_v21 = vld [vmem:[%s3744_s9 + $0x24] ss:$16 sps:$4 sm:$0xff]   ;;  %v3135_v22 = vld [vmem:[%s3744_s9 + $0x20] ss:$16 sps:$4 sm:$0xff]  }
  0xcf   : > { %1286 = vmatpush1.bf16.msra.mxu0 %v3045_v23  ;;  %v3177_v23 = vld [vmem:[%s3744_s9 + $0x2a0] ss:$16 sps:$4 sm:$0xff]  }
  0xd0   : > { %1329 = vmatpush1.bf16.msra.mxu1 %v3048_v24  ;;  %1287 = vmatprep.subr.bf16.mxu0 %v3053_v25  ;;  %v3179_v24 = vld [vmem:[%s3744_s9 + $0x2a4] ss:$16 sps:$4 sm:$0xff]  }
  0xd1   : > { %1330 = vmatprep.subr.bf16.mxu1 %v3056_v26  ;;  %v3140_v25 = vld [vmem:[%s3744_s9 + $0x4] ss:$16 sps:$4 sm:$0xff]   ;;  %v3138_v26 = vld [vmem:[%s3744_s9] ss:$16 sps:$4 sm:$0xff]  }
  0xd3   : > { %1288 = vmatpush1.bf16.msra.mxu0 %v3051_v27  ;;  %v3183_v27 = vld [vmem:[%s3744_s9 + $0x280] ss:$16 sps:$4 sm:$0xff]  }
  0xd4   : > { %1331 = vmatpush1.bf16.msra.mxu1 %v3054_v28  ;;  %1289 = vmatprep.subr.bf16.mxu0 %v3059_v29  ;;  %v3185_v28 = vld [vmem:[%s3744_s9 + $0x284] ss:$16 sps:$4 sm:$0xff]  }
  0xd5   : > { %1332 = vmatprep.subr.bf16.mxu1 %v3062_v30  ;;  %v3143_v29 = vld [vmem:[%s3744_s9 + $0x1e4] ss:$16 sps:$4 sm:$0xff]   ;;  %v3141_v30 = vld [vmem:[%s3744_s9 + $0x1e0] ss:$16 sps:$4 sm:$0xff]  }
  0xd7   : > { %1290 = vmatpush1.bf16.msra.mxu0 %v3057_v31  ;;  %v3189_v31 = vld [vmem:[%s3744_s9 + $0x260] ss:$16 sps:$4 sm:$0xff]  }
  0xd8   : > { %1333 = vmatpush1.bf16.msra.mxu1 %v3060_v32  ;;  %1291 = vmatprep.subr.bf16.mxu0 %v3065_v33  ;;  %v3191_v32 = vld [vmem:[%s3744_s9 + $0x264] ss:$16 sps:$4 sm:$0xff]  }
  0xd9   : > { %1334 = vmatprep.subr.bf16.mxu1 %v3068_v34  ;;  %v3146_v33 = vld [vmem:[%s3744_s9 + $0x1c4] ss:$16 sps:$4 sm:$0xff]   ;;  %v3144_v34 = vld [vmem:[%s3744_s9 + $0x1c0] ss:$16 sps:$4 sm:$0xff]  }
  0xdb   : > { %1292 = vmatpush1.bf16.msra.mxu0 %v3063_v35  ;;  %v3195_v35 = vld [vmem:[%s3744_s9 + $0x240] ss:$16 sps:$4 sm:$0xff]  }
  0xdc   : > { %1335 = vmatpush1.bf16.msra.mxu1 %v3066_v36  ;;  %1293 = vmatprep.subr.bf16.mxu0 %v3071_v37  ;;  %v3197_v36 = vld [vmem:[%s3744_s9 + $0x244] ss:$16 sps:$4 sm:$0xff]  }
  0xdd   : > { %1336 = vmatprep.subr.bf16.mxu1 %v3074_v38  ;;  %v3149_v37 = vld [vmem:[%s3744_s9 + $0x1a4] ss:$16 sps:$4 sm:$0xff]   ;;  %v3147_v38 = vld [vmem:[%s3744_s9 + $0x1a0] ss:$16 sps:$4 sm:$0xff]  }
  0xdf   : > { %1294 = vmatpush2.bf16.msra.mxu0 %v3069_v39  ;;  %v3201_v39 = vld [vmem:[%s3744_s9 + $0x220] ss:$16 sps:$4 sm:$0xff]  }
  0xe0   : > { %1337 = vmatpush2.bf16.msra.mxu1 %v3072_v40  ;;  %1295 = vmatprep.subr.bf16.mxu0 %v3077_v41  ;;  %v3203_v40 = vld [vmem:[%s3744_s9 + $0x224] ss:$16 sps:$4 sm:$0xff]  }
  0xe1   : > { %1338 = vmatprep.subr.bf16.mxu1 %v3080_v42  ;;  %v3152_v41 = vld [vmem:[%s3744_s9 + $0x184] ss:$16 sps:$4 sm:$0xff]   ;;  %v3150_v42 = vld [vmem:[%s3744_s9 + $0x180] ss:$16 sps:$4 sm:$0xff]  }
  0xe3   : > { %1296 = vmatpush2.bf16.msra.mxu0 %v3075_v43  ;;  %v3207_v43 = vld [vmem:[%s3744_s9 + $0x200] ss:$16 sps:$4 sm:$0xff]  }
  0xe4   : > { %1339 = vmatpush2.bf16.msra.mxu1 %v3078_v44  ;;  %1297 = vmatprep.subr.bf16.mxu0 %v3083_v45  ;;  %v3209_v44 = vld [vmem:[%s3744_s9 + $0x204] ss:$16 sps:$4 sm:$0xff]  }
  0xe5   : > { %1340 = vmatprep.subr.bf16.mxu1 %v3086_v46  ;;  %v3155_v45 = vld [vmem:[%s3744_s9 + $0x164] ss:$16 sps:$4 sm:$0xff]   ;;  %v3153_v46 = vld [vmem:[%s3744_s9 + $0x160] ss:$16 sps:$4 sm:$0xff]  }
  0xe7   : > { %1298 = vmatpush2.bf16.msra.mxu0 %v3081_v47  ;;  %v3213_v47 = vld [vmem:[%s3744_s9 + $0x3e0] ss:$16 sps:$4 sm:$0xff]  }
  0xe8   : > { %1341 = vmatpush2.bf16.msra.mxu1 %v3084_v48  ;;  %1299 = vmatprep.subr.bf16.mxu0 %v3089_v49  ;;  %v3215_v48 = vld [vmem:[%s3744_s9 + $0x3e4] ss:$16 sps:$4 sm:$0xff]  }
  0xe9   : > { %1342 = vmatprep.subr.bf16.mxu1 %v3092_v50  ;;  %v3158_v49 = vld [vmem:[%s3744_s9 + $0x144] ss:$16 sps:$4 sm:$0xff]   ;;  %v3156_v50 = vld [vmem:[%s3744_s9 + $0x140] ss:$16 sps:$4 sm:$0xff]  }
  0xeb   : > { %1300 = vmatpush2.bf16.msra.mxu0 %v3087_v51  ;;  %v3219_v51 = vld [vmem:[%s3744_s9 + $0x3c0] ss:$16 sps:$4 sm:$0xff]  }
  0xec   : > { %1343 = vmatpush2.bf16.msra.mxu1 %v3090_v52  ;;  %1301 = vmatprep.subr.bf16.mxu0 %v3095_v53  ;;  %v3221_v52 = vld [vmem:[%s3744_s9 + $0x3c4] ss:$16 sps:$4 sm:$0xff]  }
  0xed   : > { %1344 = vmatprep.subr.bf16.mxu1 %v3098_v54  ;;  %v3161_v53 = vld [vmem:[%s3744_s9 + $0x124] ss:$16 sps:$4 sm:$0xff]   ;;  %v3159_v54 = vld [vmem:[%s3744_s9 + $0x120] ss:$16 sps:$4 sm:$0xff]  }
  0xef   : > { %1302 = vmatpush2.bf16.msra.mxu0 %v3093_v55  ;;  %v3225_v55 = vld [vmem:[%s3744_s9 + $0x3a0] ss:$16 sps:$4 sm:$0xff]  }
  0xf0   : > { %1345 = vmatpush2.bf16.msra.mxu1 %v3096_v56  ;;  %1303 = vmatprep.subr.bf16.mxu0 %v3101_v57  ;;  %v3227_v56 = vld [vmem:[%s3744_s9 + $0x3a4] ss:$16 sps:$4 sm:$0xff]  }
  0xf1   : > { %1346 = vmatprep.subr.bf16.mxu1 %v3104_v58  ;;  %v3164_v57 = vld [vmem:[%s3744_s9 + $0x104] ss:$16 sps:$4 sm:$0xff]   ;;  %v3162_v58 = vld [vmem:[%s3744_s9 + $0x100] ss:$16 sps:$4 sm:$0xff]  }
  0xf3   : > { %1304 = vmatpush2.bf16.msra.mxu0 %v3099_v59  ;;  %v3231_v59 = vld [vmem:[%s3744_s9 + $0x380] ss:$16 sps:$4 sm:$0xff]  }
  0xf4   : > { %1347 = vmatpush2.bf16.msra.mxu1 %v3102_v60  ;;  %1305 = vmatprep.subr.bf16.mxu0 %v3107_v61  ;;  %v3233_v60 = vld [vmem:[%s3744_s9 + $0x384] ss:$16 sps:$4 sm:$0xff]   ;;  %v3170_v61 = vld [vmem:[%s3744_s9 + $0xec] ss:$16 sps:$4 sm:$0xff]  }
  0xf5   : > { %1348 = vmatprep.subr.bf16.mxu1 %v3110_v62  ;;  %v3237_v62 = vld [vmem:[%s3744_s9 + $0x360] ss:$16 sps:$4 sm:$0xff]  }
  0xf7   : > { %1306 = vmatpush2.bf16.msra.mxu0 %v3105_v63  ;;  %v3239_v63 = vld [vmem:[%s3744_s9 + $0x364] ss:$16 sps:$4 sm:$0xff]  }
  0xf8   : > { %1349 = vmatpush2.bf16.msra.mxu1 %v3108_v0  ;;  %1307 = vmatprep.subr.bf16.mxu0 %v3113_v1  ;;  %v3245_v0 = vld [vmem:[%s3744_s9 + $0x344] ss:$16 sps:$4 sm:$0xff]   ;;  %v3243_v1 = vld [vmem:[%s3744_s9 + $0x340] ss:$16 sps:$4 sm:$0xff]  }
  0xf9   : > { %1350 = vmatprep.subr.bf16.mxu1 %v3116_v2  ;;  %v3251_v2 = vld [vmem:[%s3744_s9 + $0x324] ss:$16 sps:$4 sm:$0xff]  }
  0xfb   : > { %1308 = vmatpush2.bf16.msra.mxu0 %v3111_v3  ;;  %v3249_v3 = vld [vmem:[%s3744_s9 + $0x320] ss:$16 sps:$4 sm:$0xff]  }
  0xfc   : > { %1351 = vmatpush2.bf16.msra.mxu1 %v3114_v4  ;;  %2151 = vmatprep.subr.bf16.mxu0 %v3119_v7  ;;  %v3257_v4 = vld [vmem:[%s3744_s9 + $0x304] ss:$16 sps:$4 sm:$0xff]   ;;  %v3255_v7 = vld [vmem:[%s3744_s9 + $0x300] ss:$16 sps:$4 sm:$0xff]  }
  0xfd   : > { %2194 = vmatprep.subr.bf16.mxu1 %v3167_v15 }
  0xfe   : > { %1310 = vmatmul.mubr.bf16.vlgmr.msra.gmra.mxu0 %v3821_v5  ;;  %v3131_v5 = vld [vmem:[%s3744_s9 + $0x64] ss:$16 sps:$4 sm:$0xff]  }
  0xff   : > { %1353 = vmatmul.mubr.bf16.vlgmr.msra.gmra.mxu1 %v3823_v6  ;;  %2152 = vmatpush1.bf16.msra.mxu0 %v3117_v8  ;;  %v3129_v6 = vld [vmem:[%s3744_s9 + $0x60] ss:$16 sps:$4 sm:$0xff]   ;;  %v3263_v8 = vld [vmem:[%s3744_s9 + $0x2ec] ss:$16 sps:$4 sm:$0xff]  }
 0x100   : > { %2153 = vmatprep.subr.bf16.mxu0 %v3122_v9  ;;  %2195 = vmatpush1.bf16.msra.mxu1 %v3165_v17  ;;  %v511_v9 = vlaneseq }
 0x101   : > { %2196 = vmatprep.subr.bf16.mxu1 %v3173_v20 }
 0x103   : > { %2154 = vmatpush1.bf16.msra.mxu0 %v3120_v10  ;;  %v3957_v10 = vshrl.u32 %v511_v9, 7  ;;  %v3254_v9 = vld [vmem:[%s3744_s9 + $0x12c] ss:$16 sps:$4 sm:$0xff]  }
 0x104   : > { %2155 = vmatprep.subr.bf16.mxu0 %v3125_v11  ;;  %2197 = vmatpush1.bf16.msra.mxu1 %v3171_v19 }
 0x105   : > { %2198 = vmatprep.subr.bf16.mxu1 %v3179_v24  ;;  %v517_v11 = vsub.s32 1, %v3957_v10 }
 0x107   : > { %2156 = vmatpush1.bf16.msra.mxu0 %v3123_v12  ;;  %v3962_v12 = vld [vmem:[%s315_s18] sm:$0xf] }
 0x108   : > { %2157 = vmatprep.subr.bf16.mxu0 %v3128_v13  ;;  %2199 = vmatpush1.bf16.msra.mxu1 %v3177_v23  ;;  %v513_v13 = vsub.s32 0, %v3957_v10 }
 0x109   : > { %2200 = vmatprep.subr.bf16.mxu1 %v3185_v28 }
 0x10b   : > { %2158 = vmatpush1.bf16.msra.mxu0 %v3126_v14  ;;  %v518_v14 = vrot.slane %v3962_v12, %v517_v11 }
 0x10c   : > { %2159 = vmatprep.subr.bf16.mxu0 %v3131_v5  ;;  %2201 = vmatpush1.bf16.msra.mxu1 %v3183_v27  ;;  %v514_v5 = vrot.slane %v3962_v12, %v513_v13 }
 0x10d   : > { %2202 = vmatprep.subr.bf16.mxu1 %v3191_v32 }
 0x10f   : > { %2160 = vmatpush1.bf16.msra.mxu0 %v3129_v6 }
 0x110   : > { %2161 = vmatprep.subr.bf16.mxu0 %v3134_v16  ;;  %2203 = vmatpush1.bf16.msra.mxu1 %v3189_v31 }
 0x111   : > { %2204 = vmatprep.subr.bf16.mxu1 %v3197_v36 }
 0x113   : > { %2162 = vmatpush1.bf16.msra.mxu0 %v3132_v18 }
 0x114   : > { %2163 = vmatprep.subr.bf16.mxu0 %v3137_v21  ;;  %2205 = vmatpush1.bf16.msra.mxu1 %v3195_v35  ;;  %v3168_v35 = vld [vmem:[%s3744_s9 + $0xe8] ss:$16 sps:$4 sm:$0xff]  }
 0x115   : > { %2206 = vmatprep.subr.bf16.mxu1 %v3203_v40  ;;  %v3180_v40 = vld [vmem:[%s3744_s9 + $0xa8] ss:$16 sps:$4 sm:$0xff]  }
 0x117   : > { %2164 = vmatpush1.bf16.msra.mxu0 %v3135_v22 }
 0x118   : > { %2165 = vmatprep.subr.bf16.mxu0 %v3140_v25  ;;  %2207 = vmatpush1.bf16.msra.mxu1 %v3201_v39  ;;  %v3182_v39 = vld [vmem:[%s3744_s9 + $0xac] ss:$16 sps:$4 sm:$0xff]  }
 0x119   : > { %2208 = vmatprep.subr.bf16.mxu1 %v3209_v44  ;;  %v3192_v44 = vld [vmem:[%s3744_s9 + $0x68] ss:$16 sps:$4 sm:$0xff]  }
 0x11b   : > { %2166 = vmatpush1.bf16.msra.mxu0 %v3138_v26 }
 0x11c   : > { %2167 = vmatprep.subr.bf16.mxu0 %v3143_v29  ;;  %2209 = vmatpush1.bf16.msra.mxu1 %v3207_v43  ;;  %v3194_v43 = vld [vmem:[%s3744_s9 + $0x6c] ss:$16 sps:$4 sm:$0xff]  }
 0x11d   : > { %2210 = vmatprep.subr.bf16.mxu1 %v3215_v48  ;;  %v3204_v48 = vld [vmem:[%s3744_s9 + $0x28] ss:$16 sps:$4 sm:$0xff]  }
 0x11f   : > { %2168 = vmatpush2.bf16.msra.mxu0 %v3141_v30 }
 0x120   : > { %2169 = vmatprep.subr.bf16.mxu0 %v3146_v33  ;;  %2211 = vmatpush2.bf16.msra.mxu1 %v3213_v47  ;;  %v3206_v47 = vld [vmem:[%s3744_s9 + $0x2c] ss:$16 sps:$4 sm:$0xff]  }
 0x121   : > { %2212 = vmatprep.subr.bf16.mxu1 %v3221_v52  ;;  %v3216_v52 = vld [vmem:[%s3744_s9 + $0x1e8] ss:$16 sps:$4 sm:$0xff]  }
 0x123   : > { %2170 = vmatpush2.bf16.msra.mxu0 %v3144_v34 }
 0x124   : > { %2171 = vmatprep.subr.bf16.mxu0 %v3149_v37  ;;  %2213 = vmatpush2.bf16.msra.mxu1 %v3219_v51  ;;  %v3176_v37 = vld [vmem:[%s3744_s9 + $0xcc] ss:$16 sps:$4 sm:$0xff]  }
 0x125   : > { %2214 = vmatprep.subr.bf16.mxu1 %v3227_v56  ;;  %v3218_v51 = vld [vmem:[%s3744_s9 + $0x1ec] ss:$16 sps:$4 sm:$0xff]   ;;  %v3228_v56 = vld [vmem:[%s3744_s9 + $0x1a8] ss:$16 sps:$4 sm:$0xff]  }
 0x127   : > { %2172 = vmatpush2.bf16.msra.mxu0 %v3147_v38  ;;  %v3174_v38 = vld [vmem:[%s3744_s9 + $0xc8] ss:$16 sps:$4 sm:$0xff]  }
 0x128   : > { %2173 = vmatprep.subr.bf16.mxu0 %v3152_v41  ;;  %2215 = vmatpush2.bf16.msra.mxu1 %v3225_v55  ;;  %v3188_v41 = vld [vmem:[%s3744_s9 + $0x8c] ss:$16 sps:$4 sm:$0xff]  }
 0x129   : > { %2216 = vmatprep.subr.bf16.mxu1 %v3233_v60  ;;  %v3230_v55 = vld [vmem:[%s3744_s9 + $0x1ac] ss:$16 sps:$4 sm:$0xff]   ;;  %v525_v60 = vsub.s32 3, %v3957_v10 }
 0x12b   : > { %2174 = vmatpush2.bf16.msra.mxu0 %v3150_v42  ;;  %v3186_v42 = vld [vmem:[%s3744_s9 + $0x88] ss:$16 sps:$4 sm:$0xff]  }
 0x12c   : > { %2175 = vmatprep.subr.bf16.mxu0 %v3155_v45  ;;  %2217 = vmatpush2.bf16.msra.mxu1 %v3231_v59  ;;  %v3200_v45 = vld [vmem:[%s3744_s9 + $0x4c] ss:$16 sps:$4 sm:$0xff]  }
 0x12d   : > { %2218 = vmatprep.subr.bf16.mxu1 %v3239_v63  ;;  %v3242_v59 = vld [vmem:[%s3744_s9 + $0x16c] ss:$16 sps:$4 sm:$0xff]  }
 0x12e   : > { %v3248_v63 = vld [vmem:[%s3744_s9 + $0x14c] ss:$16 sps:$4 sm:$0xff]  }
 0x12f   : > { %2176 = vmatpush2.bf16.msra.mxu0 %v3153_v46  ;;  %v3198_v46 = vld [vmem:[%s3744_s9 + $0x48] ss:$16 sps:$4 sm:$0xff]  }
 0x130   : > { %2177 = vmatprep.subr.bf16.mxu0 %v3158_v49  ;;  %2219 = vmatpush2.bf16.msra.mxu1 %v3237_v62  ;;  %v3212_v49 = vld [vmem:[%s3744_s9 + $0xc] ss:$16 sps:$4 sm:$0xff]   ;;  %v3240_v62 = vld [vmem:[%s3744_s9 + $0x168] ss:$16 sps:$4 sm:$0xff]  }
 0x131   : > { %2220 = vmatprep.subr.bf16.mxu1 %v3245_v0  ;;  %v526_v0 = vrot.slane %v3962_v12, %v525_v60 }
 0x133   : > { %2178 = vmatpush2.bf16.msra.mxu0 %v3156_v50  ;;  %v3210_v50 = vld [vmem:[%s3744_s9 + $0x8] ss:$16 sps:$4 sm:$0xff]  }
 0x134   : > { %2179 = vmatprep.subr.bf16.mxu0 %v3161_v53  ;;  %2221 = vmatpush2.bf16.msra.mxu1 %v3243_v1  ;;  %v3224_v53 = vld [vmem:[%s3744_s9 + $0x1cc] ss:$16 sps:$4 sm:$0xff]  }
 0x135   : > { %2222 = vmatprep.subr.bf16.mxu1 %v3251_v2 }
 0x137   : > { %2180 = vmatpush2.bf16.msra.mxu0 %v3159_v54  ;;  %v3222_v54 = vld [vmem:[%s3744_s9 + $0x1c8] ss:$16 sps:$4 sm:$0xff]  }
 0x138   : > { %2181 = vmatprep.subr.bf16.mxu0 %v3164_v57  ;;  %2223 = vmatpush2.bf16.msra.mxu1 %v3249_v3  ;;  %v3236_v57 = vld [vmem:[%s3744_s9 + $0x18c] ss:$16 sps:$4 sm:$0xff]  }
 0x139   : > { %2224 = vmatprep.subr.bf16.mxu1 %v3257_v4  ;;  %v3246_v4 = vld [vmem:[%s3744_s9 + $0x148] ss:$16 sps:$4 sm:$0xff]  }
 0x13b   : > { %2182 = vmatpush2.bf16.msra.mxu0 %v3162_v58  ;;  %v3234_v58 = vld [vmem:[%s3744_s9 + $0x188] ss:$16 sps:$4 sm:$0xff]  }
 0x13c   : > { %2237 = vmatprep.subr.bf16.mxu0 %v3170_v61  ;;  %2225 = vmatpush2.bf16.msra.mxu1 %v3255_v7  ;;  %v521_v61 = vsub.s32 2, %v3957_v10 }
 0x13d   : > { %2280 = vmatprep.subr.bf16.mxu1 %v3263_v8 }
 0x13e   : > { %v522_v1 = vrot.slane %v3962_v12, %v521_v61  ;;  %v3260_v12 = vld [vmem:[%s3744_s9 + $0x10c] ss:$16 sps:$4 sm:$0xff]  }
 0x17e   : > { %v1225_v6 = vpop.f32.mrf.mxu0 }
 0x17f   : > { %v1268_v15 = vpop.f32.mrf.mxu1  ;;  %v1226_v19 = vadd.f32 %v1225_v6, %v514_v5 }
 0x180   : > { %v1227_v16 = vpop.f32.mrf.mxu0 }
 0x181   : > { %v1270_v17 = vpop.f32.mrf.mxu1  ;;  %v1228_v18 = vadd.f32 %v1227_v16, %v518_v14  ;;  %v1269_v27 = vadd.f32 %v1268_v15, %v1226_v19 }
 0x182   : > { %v1229_v20 = vpop.f32.mrf.mxu0 }
 0x183   : > { %v1272_v21 = vpop.f32.mrf.mxu1  ;;  %v1230_v22 = vadd.f32 %v1229_v20, %v514_v5  ;;  %v1271_v24 = vadd.f32 %v1270_v17, %v1228_v18  ;;  %v1363_v33 = vmax.f32 %v1269_v27, 0.0  ;;  %v3252_v17 = vld [vmem:[%s3744_s9 + $0x128] ss:$16 sps:$4 sm:$0xff]  }
 0x184   : > { %v1231_v23 = vpop.f32.mrf.mxu0 }
 0x185   : > { %v1273_v25 = vadd.f32 %v1272_v21, %v1230_v22  ;;  %v1232_v26 = vadd.f32 %v1231_v23, %v518_v14  ;;  %v1274_v28 = vpop.f32.mrf.mxu1  ;;  %v1364_v31 = vmax.f32 %v1271_v24, 0.0 }
 0x187   : > { %v1275_v29 = vadd.f32 %v1274_v28, %v1232_v26  ;;  %v1367_v30 = vmax.f32 %v1273_v25, 0.0  ;;  %v3258_v25 = vld [vmem:[%s3744_s9 + $0x108] ss:$16 sps:$4 sm:$0xff]  }
 0x189   : > { %v1368_v32 = vmax.f32 %v1275_v29, 0.0  ;;  %v3972_v36 = vpack.c.bf16 %v1367_v30, %v1363_v33  ;;  %v3266_v33 = vld [vmem:[%s3744_s9 + $0x2cc] ss:$16 sps:$4 sm:$0xff]  }
 0x18b   : > { %v1380_v34 = vpack.c.bf16 %v1368_v32, %v1364_v31  ;;  %v3261_v31 = vld [vmem:[%s3744_s9 + $0x2e8] ss:$16 sps:$4 sm:$0xff]  }
 0x18d   : > { %2183 = vmatprep.mubr.bf16.mxu0 %v1380_v34 }
 0x18e   : > { %2184 = vmatmul.mubr.bf16.vlgmr.msra.gmra.mxu0 %v3972_v36 }
 0x18f   : > { %2238 = vmatpush1.bf16.msra.mxu0 %v3168_v35  ;;  %2269 = vmatprep.mubr.bf16.mxu0 %v1380_v34  ;;  %v3264_v34 = vld [vmem:[%s3744_s9 + $0x2c8] ss:$16 sps:$4 sm:$0xff]   ;;  %v3269_v35 = vld [vmem:[%s3744_s9 + $0x2ac] ss:$16 sps:$4 sm:$0xff]  }
 0x190   : > { %2239 = vmatprep.subr.bf16.mxu0 %v3176_v37  ;;  %v3267_v37 = vld [vmem:[%s3744_s9 + $0x2a8] ss:$16 sps:$4 sm:$0xff]  }
 0x193   : > { %2240 = vmatpush1.bf16.msra.mxu0 %v3174_v38  ;;  %v3272_v38 = vld [vmem:[%s3744_s9 + $0x28c] ss:$16 sps:$4 sm:$0xff]  }
 0x194   : > { %2241 = vmatprep.subr.bf16.mxu0 %v3182_v39  ;;  %v3270_v39 = vld [vmem:[%s3744_s9 + $0x288] ss:$16 sps:$4 sm:$0xff]  }
 0x197   : > { %2242 = vmatpush1.bf16.msra.mxu0 %v3180_v40  ;;  %v3273_v40 = vld [vmem:[%s3744_s9 + $0x268] ss:$16 sps:$4 sm:$0xff]  }
 0x198   : > { %2243 = vmatprep.subr.bf16.mxu0 %v3188_v41  ;;  %v3278_v41 = vld [vmem:[%s3744_s9 + $0x24c] ss:$16 sps:$4 sm:$0xff]  }
 0x19b   : > { %2244 = vmatpush1.bf16.msra.mxu0 %v3186_v42  ;;  %v3276_v42 = vld [vmem:[%s3744_s9 + $0x248] ss:$16 sps:$4 sm:$0xff]  }
 0x19c   : > { %2245 = vmatprep.subr.bf16.mxu0 %v3194_v43  ;;  %v3281_v43 = vld [vmem:[%s3744_s9 + $0x22c] ss:$16 sps:$4 sm:$0xff]  }
 0x19f   : > { %2246 = vmatpush1.bf16.msra.mxu0 %v3192_v44  ;;  %v3279_v44 = vld [vmem:[%s3744_s9 + $0x228] ss:$16 sps:$4 sm:$0xff]  }
 0x1a0   : > { %2247 = vmatprep.subr.bf16.mxu0 %v3200_v45  ;;  %v3284_v45 = vld [vmem:[%s3744_s9 + $0x20c] ss:$16 sps:$4 sm:$0xff]  }
 0x1a3   : > { %2248 = vmatpush1.bf16.msra.mxu0 %v3198_v46  ;;  %v3282_v46 = vld [vmem:[%s3744_s9 + $0x208] ss:$16 sps:$4 sm:$0xff]  }
 0x1a4   : > { %2249 = vmatprep.subr.bf16.mxu0 %v3206_v47  ;;  %v3287_v47 = vld [vmem:[%s3744_s9 + $0x3ec] ss:$16 sps:$4 sm:$0xff]  }
 0x1a7   : > { %2250 = vmatpush1.bf16.msra.mxu0 %v3204_v48  ;;  %v3285_v48 = vld [vmem:[%s3744_s9 + $0x3e8] ss:$16 sps:$4 sm:$0xff]  }
 0x1a8   : > { %2251 = vmatprep.subr.bf16.mxu0 %v3212_v49  ;;  %v3290_v49 = vld [vmem:[%s3744_s9 + $0x3cc] ss:$16 sps:$4 sm:$0xff]  }
 0x1ab   : > { %2252 = vmatpush1.bf16.msra.mxu0 %v3210_v50  ;;  %v3288_v50 = vld [vmem:[%s3744_s9 + $0x3c8] ss:$16 sps:$4 sm:$0xff]  }
 0x1ac   : > { %2253 = vmatprep.subr.bf16.mxu0 %v3218_v51  ;;  %v3293_v51 = vld [vmem:[%s3744_s9 + $0x3ac] ss:$16 sps:$4 sm:$0xff]  }
 0x1af   : > { %2254 = vmatpush2.bf16.msra.mxu0 %v3216_v52  ;;  %v3291_v52 = vld [vmem:[%s3744_s9 + $0x3a8] ss:$16 sps:$4 sm:$0xff]  }
 0x1b0   : > { %2255 = vmatprep.subr.bf16.mxu0 %v3224_v53  ;;  %v3296_v53 = vld [vmem:[%s3744_s9 + $0x38c] ss:$16 sps:$4 sm:$0xff]  }
 0x1b3   : > { %2256 = vmatpush2.bf16.msra.mxu0 %v3222_v54  ;;  %v3294_v54 = vld [vmem:[%s3744_s9 + $0x388] ss:$16 sps:$4 sm:$0xff]  }
 0x1b4   : > { %2257 = vmatprep.subr.bf16.mxu0 %v3230_v55  ;;  %v3299_v55 = vld [vmem:[%s3744_s9 + $0x36c] ss:$16 sps:$4 sm:$0xff]  }
 0x1b7   : > { %2258 = vmatpush2.bf16.msra.mxu0 %v3228_v56  ;;  %v3297_v56 = vld [vmem:[%s3744_s9 + $0x368] ss:$16 sps:$4 sm:$0xff]  }
 0x1b8   : > { %2259 = vmatprep.subr.bf16.mxu0 %v3236_v57  ;;  %v3302_v57 = vld [vmem:[%s3744_s9 + $0x34c] ss:$16 sps:$4 sm:$0xff]  }
 0x1bb   : > { %2260 = vmatpush2.bf16.msra.mxu0 %v3234_v58  ;;  %v3300_v58 = vld [vmem:[%s3744_s9 + $0x348] ss:$16 sps:$4 sm:$0xff]  }
 0x1bc   : > { %2261 = vmatprep.subr.bf16.mxu0 %v3242_v59  ;;  %v3305_v59 = vld [vmem:[%s3744_s9 + $0x32c] ss:$16 sps:$4 sm:$0xff]  }
 0x1be   : > { %v1311_v2 = vpop.f32.mrf.mxu0 }
 0x1bf   : > { %v1354_v3 = vpop.f32.mrf.mxu1  ;;  %2262 = vmatpush2.bf16.msra.mxu0 %v3240_v62  ;;  %v1312_v5 = vadd.f32 %v1311_v2, %v522_v1  ;;  %v3303_v62 = vld [vmem:[%s3744_s9 + $0x328] ss:$16 sps:$4 sm:$0xff]  }
 0x1c0   : > { %v1313_v7 = vpop.f32.mrf.mxu0  ;;  %2263 = vmatprep.subr.bf16.mxu0 %v3248_v63  ;;  %v3308_v63 = vld [vmem:[%s3744_s9 + $0x30c] ss:$16 sps:$4 sm:$0xff]  }
 0x1c1   : > { %v1356_v8 = vpop.f32.mrf.mxu1  ;;  %v1314_v14 = vadd.f32 %v1313_v7, %v526_v0  ;;  %v1355_v22 = vadd.f32 %v1354_v3, %v1312_v5  ;;  %v1371_v3 = vld [vmem:[#allocation2 + $0x30] sm:$0xff] }
 0x1c2   : > { %v1315_v6 = vpop.f32.mrf.mxu0 }
 0x1c3   : > { %v1358_v15 = vpop.f32.mrf.mxu1  ;;  %v1316_v16 = vadd.f32 %v1315_v6, %v522_v1  ;;  %2264 = vmatpush2.bf16.msra.mxu0 %v3246_v4  ;;  %v1357_v19 = vadd.f32 %v1356_v8, %v1314_v14  ;;  %v1365_v29 = vmax.f32 %v1355_v22, 0.0 }
 0x1c4   : > { %v1317_v18 = vpop.f32.mrf.mxu0  ;;  %2265 = vmatprep.subr.bf16.mxu0 %v3254_v9  ;;  %v1372_v9 = vld [vmem:[#allocation2] sm:$0xff] }
 0x1c5   : > { %v1359_v20 = vadd.f32 %v1358_v15, %v1316_v16  ;;  %v1318_v21 = vadd.f32 %v1317_v18, %v526_v0  ;;  %v1360_v23 = vpop.f32.mrf.mxu1  ;;  %v1366_v27 = vmax.f32 %v1357_v19, 0.0  ;;  %v3306_v0 = vld [vmem:[%s3744_s9 + $0x308] ss:$16 sps:$4 sm:$0xff]   ;;  %v1375_v15 = vld [vmem:[#allocation2 + $0x8] sm:$0xff] }
 0x1c6   : > { %v1376_v19 = vld [vmem:[#allocation2 + $0x20] sm:$0xff] }
 0x1c7   : > { %v1361_v24 = vadd.f32 %v1360_v23, %v1318_v21  ;;  %2266 = vmatpush2.bf16.msra.mxu0 %v3252_v17  ;;  %v1369_v26 = vmax.f32 %v1359_v20, 0.0 }
 0x1c8   : > { %2267 = vmatprep.subr.bf16.mxu0 %v3260_v12 }
 0x1c9   : > { %v1370_v28 = vmax.f32 %v1361_v24, 0.0  ;;  %v4014_v32 = vpack.c.bf16 %v1369_v26, %v1365_v29  ;;  %v1373_v26 = vld [vmem:[#allocation2 + $0x18] sm:$0xff] }
 0x1cb   : > { %v1382_v30 = vpack.c.bf16 %v1370_v28, %v1366_v27  ;;  %2268 = vmatpush2.bf16.msra.mxu0 %v3258_v25 }
 0x1cd   : > { %2226 = vmatprep.mubr.bf16.mxu1 %v1382_v30 }
 0x1ce   : > { %2270 = vmatmul.mubr.bf16.vlgmr.msra.gmra.mxu0 %v3972_v36  ;;  %2227 = vmatmul.mubr.bf16.vlgmr.msra.gmra.mxu1 %v4014_v32  ;;  %v3275_v36 = vld [vmem:[%s3744_s9 + $0x26c] ss:$16 sps:$4 sm:$0xff]  }
 0x1cf   : > { %2281 = vmatpush1.bf16.msra.mxu1 %v3261_v31  ;;  %2312 = vmatprep.mubr.bf16.mxu1 %v1382_v30  ;;  %v1374_v30 = vld [vmem:[#allocation2 + $0x10] sm:$0xff] }
 0x1d0   : > { %2282 = vmatprep.subr.bf16.mxu1 %v3266_v33 }
 0x1d3   : > { %2283 = vmatpush1.bf16.msra.mxu1 %v3264_v34  ;;  %v1377_v34 = vld [vmem:[#allocation2 + $0x28] sm:$0xff] }
 0x1d4   : > { %2284 = vmatprep.subr.bf16.mxu1 %v3269_v35 }
 0x1d7   : > { %2285 = vmatpush1.bf16.msra.mxu1 %v3267_v37 }
 0x1d8   : > { %2286 = vmatprep.subr.bf16.mxu1 %v3272_v38 }
 0x1db   : > { %2287 = vmatpush1.bf16.msra.mxu1 %v3270_v39 }
 0x1dc   : > { %2288 = vmatprep.subr.bf16.mxu1 %v3275_v36  ;;  %v1378_v36 = vld [vmem:[#allocation2 + $0x38] sm:$0xff] }
 0x1df   : > { %2289 = vmatpush1.bf16.msra.mxu1 %v3273_v40 }
 0x1e0   : > { %2290 = vmatprep.subr.bf16.mxu1 %v3278_v41 }
 0x1e3   : > { %2291 = vmatpush1.bf16.msra.mxu1 %v3276_v42 }
 0x1e4   : > { %2292 = vmatprep.subr.bf16.mxu1 %v3281_v43 }
 0x1e7   : > { %2293 = vmatpush1.bf16.msra.mxu1 %v3279_v44 }
 0x1e8   : > { %2294 = vmatprep.subr.bf16.mxu1 %v3284_v45 }
 0x1eb   : > { %2295 = vmatpush1.bf16.msra.mxu1 %v3282_v46 }
 0x1ec   : > { %2296 = vmatprep.subr.bf16.mxu1 %v3287_v47 }
 0x1ef   : > { %2297 = vmatpush2.bf16.msra.mxu1 %v3285_v48 }
 0x1f0   : > { %2298 = vmatprep.subr.bf16.mxu1 %v3290_v49 }
 0x1f3   : > { %2299 = vmatpush2.bf16.msra.mxu1 %v3288_v50 }
 0x1f4   : > { %2300 = vmatprep.subr.bf16.mxu1 %v3293_v51 }
 0x1f7   : > { %2301 = vmatpush2.bf16.msra.mxu1 %v3291_v52 }
 0x1f8   : > { %2302 = vmatprep.subr.bf16.mxu1 %v3296_v53 }
 0x1fb   : > { %2303 = vmatpush2.bf16.msra.mxu1 %v3294_v54 }
 0x1fc   : > { %2304 = vmatprep.subr.bf16.mxu1 %v3299_v55 }
 0x1ff   : > { %2305 = vmatpush2.bf16.msra.mxu1 %v3297_v56 }
 0x200   : > { %2306 = vmatprep.subr.bf16.mxu1 %v3302_v57 }
 0x203   : > { %2307 = vmatpush2.bf16.msra.mxu1 %v3300_v58 }
 0x204   : > { %2308 = vmatprep.subr.bf16.mxu1 %v3305_v59 }
 0x207   : > { %2309 = vmatpush2.bf16.msra.mxu1 %v3303_v62 }
 0x208   : > { %2310 = vmatprep.subr.bf16.mxu1 %v3308_v63 }
 0x20b   : > { %2311 = vmatpush2.bf16.msra.mxu1 %v3306_v0 }
 0x20e   : > { %2313 = vmatmul.mubr.bf16.vlgmr.msra.gmra.mxu1 %v4014_v32 }
 0x24e   : > { %v2185_v1 = vpop.f32.mrf.mxu0 }
 0x250   : > { %v2187_v2 = vpop.f32.mrf.mxu0 }
 0x252   : > { %v2189_v8 = vpop.f32.mrf.mxu0 }
 0x254   : > { %v2191_v12 = vpop.f32.mrf.mxu0 }
 0x28e   : > { %v2228_v4 = vpop.f32.mrf.mxu1  ;;  %v2271_v24 = vpop.f32.mrf.mxu0 }
 0x28f   : > { %v2229_v7 = vadd.f32 %v2228_v4, %v2185_v1 }
 0x290   : > { %v2230_v14 = vpop.f32.mrf.mxu1  ;;  %v2273_v25 = vpop.f32.mrf.mxu0 }
 0x291   : > { %v2323_v5 = vadd.f32 %v2229_v7, %v1371_v3  ;;  %v2231_v6 = vadd.f32 %v2230_v14, %v2187_v2 }
 0x292   : > { %v2232_v16 = vpop.f32.mrf.mxu1  ;;  %v2275_v29 = vpop.f32.mrf.mxu0 }
 0x293   : > { %2331 = vst [vmem:[#allocation2 + $0x30] sm:$0xff] %v2323_v5  ;;  %v2324_v17 = vadd.f32 %v2231_v6, %v1372_v9  ;;  %v2233_v18 = vadd.f32 %v2232_v16, %v2189_v8 }
 0x294   : > { %v2234_v20 = vpop.f32.mrf.mxu1  ;;  %v2277_v39 = vpop.f32.mrf.mxu0 }
 0x295   : > { %2332 = vst [vmem:[#allocation2] sm:$0xff] %v2324_v17  ;;  %v2327_v21 = vadd.f32 %v2233_v18, %v1375_v15  ;;  %v2235_v22 = vadd.f32 %v2234_v20, %v2191_v12 }
 0x297   : > { %2335 = vst [vmem:[#allocation2 + $0x8] sm:$0xff] %v2327_v21  ;;  %v2328_v23 = vadd.f32 %v2235_v22, %v1376_v19 }
 0x299   : > { %2336 = vst [vmem:[#allocation2 + $0x20] sm:$0xff] %v2328_v23 }
 0x2ce   : > { %v2314_v27 = vpop.f32.mrf.mxu1 }
 0x2cf   : > { %v2315_v28 = vadd.f32 %v2314_v27, %v2271_v24 }
 0x2d0   : > { %v2316_v31 = vpop.f32.mrf.mxu1 }
 0x2d1   : > { %v2325_v32 = vadd.f32 %v2315_v28, %v1373_v26  ;;  %v2317_v33 = vadd.f32 %v2316_v31, %v2273_v25 }
 0x2d2   : > { %v2318_v35 = vpop.f32.mrf.mxu1 }
 0x2d3   : > { %2333 = vst [vmem:[#allocation2 + $0x18] sm:$0xff] %v2325_v32  ;;  %v2326_v37 = vadd.f32 %v2317_v33, %v1374_v30  ;;  %v2319_v38 = vadd.f32 %v2318_v35, %v2275_v29 }
 0x2d4   : > { %v2320_v40 = vpop.f32.mrf.mxu1 }
 0x2d5   : > { %2334 = vst [vmem:[#allocation2 + $0x10] sm:$0xff] %v2326_v37  ;;  %v2329_v41 = vadd.f32 %v2319_v38, %v1377_v34  ;;  %v2321_v42 = vadd.f32 %v2320_v40, %v2277_v39  ;;  %2342 = sbr.rel (%p2811_p6) target bundleno = 740 (0x2e4), region = 68 }
 0x2d7   : > { %2337 = vst [vmem:[#allocation2 + $0x28] sm:$0xff] %v2329_v41  ;;  %v2330_v43 = vadd.f32 %v2321_v42, %v1378_v36 }
 0x2d9   : > { %2338 = vst [vmem:[#allocation2 + $0x38] sm:$0xff] %v2330_v43 }
 0x2da   : > { %v2343_v44 = vld [vmem:[#allocation2 + $0x30] sm:$0xff]  ;;  %v2351_v45 = vld [vmem:[#allocation11] sm:$0xf]  ;;  %v2344_v46 = vld [vmem:[#allocation2] sm:$0xff] }
 0x2db   : > { %v2356_v47 = vrot.slane %v2351_v45, %v513_v13  ;;  %v2360_v48 = vrot.slane %v2351_v45, %v517_v11  ;;  %v2345_v49 = vld [vmem:[#allocation2 + $0x18] sm:$0xff]  ;;  %v2364_v50 = vrot.slane %v2351_v45, %v521_v61  ;;  %v2368_v52 = vrot.slane %v2351_v45, %v525_v60  ;;  %v2347_v53 = vld [vmem:[#allocation2 + $0x8] sm:$0xff]  ;;  %v2348_v54 = vld [vmem:[#allocation2 + $0x20] sm:$0xff] }
 0x2dc   : > { %v2346_v51 = vld [vmem:[#allocation2 + $0x10] sm:$0xff] }
 0x2dd   : > { %v2373_v57 = vadd.f32 %v2356_v47, %v2343_v44  ;;  %v2374_v58 = vadd.f32 %v2360_v48, %v2344_v46  ;;  %v2375_v59 = vadd.f32 %v2364_v50, %v2345_v49  ;;  %v2376_v62 = vadd.f32 %v2368_v52, %v2346_v51 }
 0x2de   : > { %v2349_v55 = vld [vmem:[#allocation2 + $0x28] sm:$0xff]  ;;  %v2377_v13 = vadd.f32 %v2356_v47, %v2347_v53  ;;  %v2378_v63 = vadd.f32 %v2360_v48, %v2348_v54 }
 0x2df   : > { %v2379_v0 = vadd.f32 %v2364_v50, %v2349_v55  ;;  %2381 = vst [vmem:[#allocation12] sm:$0xff] %v2373_v57  ;;  %2382 = vst [vmem:[#allocation12 + $0x8] sm:$0xff] %v2374_v58 }
 0x2e0   : > { %v2350_v56 = vld [vmem:[#allocation2 + $0x38] sm:$0xff]  ;;  %2383 = vst [vmem:[#allocation12 + $0x10] sm:$0xff] %v2375_v59  ;;  %2384 = vst [vmem:[#allocation12 + $0x18] sm:$0xff] %v2376_v62 }
 0x2e1   : > { %v2380_v11 = vadd.f32 %v2368_v52, %v2350_v56  ;;  %2385 = vst [vmem:[#allocation12 + $0x20] sm:$0xff] %v2377_v13  ;;  %2386 = vst [vmem:[#allocation12 + $0x28] sm:$0xff] %v2378_v63 }
 0x2e2   : > { %2387 = vst [vmem:[#allocation12 + $0x30] sm:$0xff] %v2379_v0 }
 0x2e3   : > { %2388 = vst [vmem:[#allocation12 + $0x38] sm:$0xff] %v2380_v11 }
 0x2e4 PF: > { %p2860_p2 = scmp.eq.s32.totalorder %s3608_s24, 3  ;;  %s3546_s21 = smov [#allocation12]  }
 0x2e5   : > { %s2399_s26 = sshll.u32 %s3546_s21, 4  ;;  %s2400_s26 = int_to_ptr.vmem [resolvable:$true] %s2399_s26 }
 0x2e6   : > { %s3445_s29 = scalar_lea.vmem %s2400_s26, 1024  ;;  %p3452_p13 = scmp.lt.s32.totalorder %s2400_s26, %s2400_s26 }
 0x2e7   : > { %p3446_p5 = scmp.ne.s32.totalorder %s2400_s26, %s3445_s29  ;;  %p3453_p4 = scmp.lt.s32.totalorder %s3445_s29, %s3445_s29 }
 0x2e9   : > { %p3447_p7 = pnand %p3446_p5, %p2860_p2  ;;  %p3454_p3 = por %p3453_p4, %p3452_p13 }
 0x2eb   : > { %p3448_p9 = pneg %p3447_p7 }
 0x2ed   : > { %p3455_p0 = pnand %p3454_p3, %p3448_p9 }
 0x2ef   : > { %3458 = shalt.err (!%p3455_p0)
}
 0x2f0   : > { %s3547_s12 = smov 512   ;;  %s3548_s16 = smov 32  }
 0x2f1   : > { %2835 = dma.vmem_to_hbm [thread:$0]  (%p2860_p2), %s2400_s26, 1024, %s4093_s5, [#allocation5], %s3547_s12, %s3547_s12, %s3548_s16  }
 0x2f2   : > { %3510 = dma.done.wait (%p2860_p2), [#allocation5], 1024  }
 0x2f3   : > { %3512 = vsyncadd (%p2860_p2), [#allocation5], 4294966272 }
 0x2f4 PF: > { %s23_s23 = sadd.s32 1, %s3535_s23   ;;  %s4111_s10 = sld [smem:[#allocation18_spill]] }
 0x2f5   : > { %p20_p10 = scmp.ge.s32.totalorder %s23_s23, 6   ;;  %s4112_s18 = smov %s3519_s19 }
 0x2f6   : > { %s4113_s19 = smov %s3523_s20  ;;  %s4114_s20 = smov %s3672_s7 }
 0x2f7   : > { %s4115_s21 = smov %s3531_s22  ;;  %22 = sbr.rel (!%p20_p10) target bundleno = 11 (0xb), region = 120 }
 0x2fa   : > { %s4116_s22 = smov %s4111_s10 }
 0x2fc   :  { %2415 = vsyncpa [#allocation4], 1 }
 0x2fd   :  { %2417 = vsyncpa [#allocation4 + $0x1], 1 }
 0x2fe   :  { %2418 = vsyncpa [#allocation7], 1 }
 0x2ff   :  { %2420 = vsyncpa [#allocation7 + $0x1], 1 }
 0x300   :  { %2421 = vsyncpa [#allocation10], 1 }
 0x301   :  { %2423 = vsyncpa [#allocation10 + $0x1], 1 }
 0x302   :  { %2424 = vsyncpa [#allocation5], 1 }
 0x303   :  { %2426 = vsyncpa [#allocation5 + $0x1], 1 }

</bundles_post_ra>
